<compile_context>
chip_gen: v7x
topology: tpu7x:2x2x1
jax: 0.10.0
libtpu: 0.0.40
codegen_flags: <defaults>
</compile_context>

<pallas_src>
import jax
import jax.numpy as jnp
from jax.experimental import pallas as pl
from jax.experimental.pallas import tpu as pltpu

IN_DIM = 28 * 28          # 784, kept unpadded (full-last-dim blocks are legal -> no zero-byte HBM traffic)
HID = 512
OUT_DIM = 10
OUT_PAD = 128             # lane-dense output (cols 10..127 are zero, sliced off in the wrapper)


def _pick_tm(batch):
    """Bucketed batch tile: big tiles (up to 512) amortize the ~0.35us/step overhead and
    MXU weight re-pushes; small buckets (bf16 sublane tile = 16) keep tiny batches cheap."""
    for tm in (16, 32, 64, 128, 256):
        if batch <= tm:
            return tm
    return 512


def mlp_kernel(x_ref, w1_ref, b1_ref, w2_ref, b2_ref, w3_ref, b3_ref, o_ref):
    # x tile: (TM, 784) bf16; weights bf16, DMA'd once and VMEM-resident across the batch
    # grid; biases f32; all matmuls accumulate in f32 on the MXU.
    h1 = jnp.dot(x_ref[...], w1_ref[...], preferred_element_type=jnp.float32) + b1_ref[...]
    h1 = jnp.maximum(h1, 0.0).astype(jnp.bfloat16)            # bias+ReLU in f32 (v5e VPU has no bf16 VALU)
    h2 = jnp.dot(h1, w2_ref[...], preferred_element_type=jnp.float32) + b2_ref[...]
    h2 = jnp.maximum(h2, 0.0).astype(jnp.bfloat16)
    logits = jnp.dot(h2, w3_ref[...], preferred_element_type=jnp.float32) + b3_ref[...]
    o_ref[...] = logits.astype(jnp.bfloat16)                   # unmasked lane-dense bf16 store


def init_params(key):
    """Deterministic synthetic init (uniform, PyTorch-style fan_in bounds), f32 masters."""
    k1, k2, k3, k4, k5, k6 = jax.random.split(key, 6)

    def lin(kw, kb, fan_in, fan_out):
        bound = 1.0 / (fan_in ** 0.5)
        w = jax.random.uniform(kw, (fan_in, fan_out), jnp.float32, -bound, bound)
        b = jax.random.uniform(kb, (1, fan_out), jnp.float32, -bound, bound)
        return w, b

    w1, b1 = lin(k1, k2, IN_DIM, HID)
    w2, b2 = lin(k3, k4, HID, HID)
    w3, b3 = lin(k5, k6, HID, OUT_DIM)
    return (w1, b1, w2, b2, w3, b3)


def prepare_params(params):
    """One-time: cast weights to bf16; pad only the tiny output dim (10->128); biases f32."""
    # TODO(synk): generation-specific weight quantization (int8 on v5e/v6e, fp8 on v7x) and
    # cross-call weight prefetch (P10) for the small-batch serving path are not implemented.
    w1, b1, w2, b2, w3, b3 = params
    w1p = w1.astype(jnp.bfloat16)
    w2p = w2.astype(jnp.bfloat16)
    w3p = jnp.pad(w3, ((0, 0), (0, OUT_PAD - OUT_DIM))).astype(jnp.bfloat16)
    b3p = jnp.pad(b3, ((0, 0), (0, OUT_PAD - OUT_DIM))).astype(jnp.float32)
    return (w1p, b1.astype(jnp.float32), w2p, b2.astype(jnp.float32), w3p, b3p)


@jax.jit
def neural_network_forward(x_nchw, prepared):
    """x_nchw: (B, 1, 28, 28) float32 -> logits (B, 10) float32."""
    w1p, b1, w2p, b2, w3p, b3p = prepared
    B = x_nchw.shape[0]
    TM = _pick_tm(B)
    B_pad = pl.cdiv(B, TM) * TM

    # nn.Flatten() + bf16 cast (+ zero pad of batch rows only). With allow_input_fusion on
    # input 0 this producer fuses into the pallas_call instead of materializing in HBM.
    x_flat = x_nchw.reshape(B, -1).astype(jnp.bfloat16)
    if B_pad != B:
        x_flat = jnp.pad(x_flat, ((0, B_pad - B), (0, 0)))

    grid = (B_pad // TM,)
    flops = 2 * B_pad * (IN_DIM * HID + HID * HID + HID * OUT_PAD)
    bytes_accessed = (
        B_pad * IN_DIM * 2                                     # bf16 activations (no K padding)
        + (w1p.size + w2p.size + w3p.size) * 2                 # bf16 weights
        + (b1.size + b2.size + b3p.size) * 4                   # f32 biases
        + B_pad * OUT_PAD * 2                                  # bf16 output
    )

    out = pl.pallas_call(
        mlp_kernel,
        out_shape=jax.ShapeDtypeStruct((B_pad, OUT_PAD), jnp.bfloat16),
        grid=grid,
        in_specs=[
            pl.BlockSpec((TM, IN_DIM), lambda i: (i, 0)),      # x: pipelined per batch tile, unpadded K
            pl.BlockSpec((IN_DIM, HID), lambda i: (0, 0)),     # weights/biases: fetched once, VMEM-resident
            pl.BlockSpec((1, HID), lambda i: (0, 0)),
            pl.BlockSpec((HID, HID), lambda i: (0, 0)),
            pl.BlockSpec((1, HID), lambda i: (0, 0)),
            pl.BlockSpec((HID, OUT_PAD), lambda i: (0, 0)),
            pl.BlockSpec((1, OUT_PAD), lambda i: (0, 0)),
        ],
        out_specs=pl.BlockSpec((TM, OUT_PAD), lambda i: (i, 0)),
        compiler_params=pltpu.CompilerParams(
            dimension_semantics=("parallel",),                 # shard batch tiles across TCs on v7x
            allow_input_fusion=[True, False, False, False, False, False, False],
        ),
        cost_estimate=pl.CostEstimate(
            flops=flops, transcendentals=0, bytes_accessed=bytes_accessed),
    )(x_flat, w1p, b1, w2p, b2, w3p, b3p)

    return out[:B, :OUT_DIM].astype(jnp.float32)


if __name__ == "__main__":
    key = jax.random.PRNGKey(0)
    kx, kp = jax.random.split(key)

    B = 8
    x = jax.random.normal(kx, (B, 1, 28, 28), jnp.float32)     # NCHW, like PyTorch MNIST
    params = init_params(kp)
    prepared = prepare_params(params)

    logits = neural_network_forward(x, prepared)
    jax.block_until_ready(logits)

    # Cross-check against a plain-JAX reference using the same bf16 weights / f32 accumulation.
    w1, b1, w2, b2, w3, b3 = params
    xf = x.reshape(B, -1).astype(jnp.bfloat16)
    h1 = jnp.maximum(
        jnp.dot(xf, w1.astype(jnp.bfloat16), preferred_element_type=jnp.float32) + b1, 0.0
    ).astype(jnp.bfloat16)
    h2 = jnp.maximum(
        jnp.dot(h1, w2.astype(jnp.bfloat16), preferred_element_type=jnp.float32) + b2, 0.0
    ).astype(jnp.bfloat16)
    ref = jnp.dot(h2, w3.astype(jnp.bfloat16), preferred_element_type=jnp.float32) + b3

    assert logits.shape == (B, OUT_DIM)
    assert jnp.allclose(logits, ref, atol=2e-2, rtol=2e-2), (
        float(jnp.max(jnp.abs(logits - ref))))

    print("KERNEL_OK")
</pallas_src>

<mosaic_0001>
module attributes {stable_mosaic.version = 11 : i64} {
  func.func @mlp_kernel(%arg0: i32, %arg1: memref<16x784xbf16, #tpu.memory_space<vmem>>, %arg2: memref<784x512xbf16, #tpu.memory_space<vmem>>, %arg3: memref<1x512xf32, #tpu.memory_space<vmem>>, %arg4: memref<512x512xbf16, #tpu.memory_space<vmem>>, %arg5: memref<1x512xf32, #tpu.memory_space<vmem>>, %arg6: memref<512x128xbf16, #tpu.memory_space<vmem>>, %arg7: memref<1x128xf32, #tpu.memory_space<vmem>>, %arg8: memref<16x128xbf16, #tpu.memory_space<vmem>>) attributes {dimension_semantics = [#tpu.dimension_semantics<parallel>], iteration_bounds = array<i64: 1>, scalar_prefetch = 0 : i64, scratch_operands = 0 : i64, tpu.core_type = #tpu.core_type<tc>, window_params = [{transform_indices = @transform_0, window_bounds = array<i64: 16, 784>}, {pipeline_mode = #tpu.pipeline_mode<synchronous>, transform_indices = @transform_1, window_bounds = array<i64: 784, 512>}, {pipeline_mode = #tpu.pipeline_mode<synchronous>, transform_indices = @transform_2, window_bounds = array<i64: 1, 512>}, {pipeline_mode = #tpu.pipeline_mode<synchronous>, transform_indices = @transform_3, window_bounds = array<i64: 512, 512>}, {pipeline_mode = #tpu.pipeline_mode<synchronous>, transform_indices = @transform_4, window_bounds = array<i64: 1, 512>}, {pipeline_mode = #tpu.pipeline_mode<synchronous>, transform_indices = @transform_5, window_bounds = array<i64: 512, 128>}, {pipeline_mode = #tpu.pipeline_mode<synchronous>, transform_indices = @transform_6, window_bounds = array<i64: 1, 128>}, {transform_indices = @transform_7, window_bounds = array<i64: 16, 128>}]} {
    %c0 = arith.constant 0 : index
    %c0_0 = arith.constant 0 : index
    %0 = vector.load %arg1[%c0, %c0_0] : memref<16x784xbf16, #tpu.memory_space<vmem>>, vector<16x784xbf16>
    %c0_1 = arith.constant 0 : index
    %c0_2 = arith.constant 0 : index
    %1 = vector.load %arg2[%c0_1, %c0_2] : memref<784x512xbf16, #tpu.memory_space<vmem>>, vector<784x512xbf16>
    %cst = arith.constant dense<0.000000e+00> : vector<16x512xf32>
    %2 = tpu.matmul %0, %1, %cst {dimension_numbers = #tpu.dot_dimension_numbers<[1], [0], [0], [1], [0, 0, 1, 1], [], []>} : vector<16x784xbf16>, vector<784x512xbf16>, vector<16x512xf32> -> vector<16x512xf32>
    %c0_3 = arith.constant 0 : index
    %c0_4 = arith.constant 0 : index
    %3 = vector.load %arg3[%c0_3, %c0_4] : memref<1x512xf32, #tpu.memory_space<vmem>>, vector<1x512xf32>
    %4 = vector.broadcast %3 : vector<1x512xf32> to vector<16x512xf32>
    %5 = arith.addf %2, %4 : vector<16x512xf32>
    %cst_5 = arith.constant 0.000000e+00 : f32
    %6 = vector.broadcast %cst_5 : f32 to vector<16x512xf32>
    %7 = arith.maximumf %5, %6 : vector<16x512xf32>
    %8 = arith.truncf %7 : vector<16x512xf32> to vector<16x512xbf16>
    %c0_6 = arith.constant 0 : index
    %c0_7 = arith.constant 0 : index
    %9 = vector.load %arg4[%c0_6, %c0_7] : memref<512x512xbf16, #tpu.memory_space<vmem>>, vector<512x512xbf16>
    %cst_8 = arith.constant dense<0.000000e+00> : vector<16x512xf32>
    %10 = tpu.matmul %8, %9, %cst_8 {dimension_numbers = #tpu.dot_dimension_numbers<[1], [0], [0], [1], [0, 0, 1, 1], [], []>} : vector<16x512xbf16>, vector<512x512xbf16>, vector<16x512xf32> -> vector<16x512xf32>
    %c0_9 = arith.constant 0 : index
    %c0_10 = arith.constant 0 : index
    %11 = vector.load %arg5[%c0_9, %c0_10] : memref<1x512xf32, #tpu.memory_space<vmem>>, vector<1x512xf32>
    %12 = vector.broadcast %11 : vector<1x512xf32> to vector<16x512xf32>
    %13 = arith.addf %10, %12 : vector<16x512xf32>
    %cst_11 = arith.constant 0.000000e+00 : f32
    %14 = vector.broadcast %cst_11 : f32 to vector<16x512xf32>
    %15 = arith.maximumf %13, %14 : vector<16x512xf32>
    %16 = arith.truncf %15 : vector<16x512xf32> to vector<16x512xbf16>
    %c0_12 = arith.constant 0 : index
    %c0_13 = arith.constant 0 : index
    %17 = vector.load %arg6[%c0_12, %c0_13] : memref<512x128xbf16, #tpu.memory_space<vmem>>, vector<512x128xbf16>
    %cst_14 = arith.constant dense<0.000000e+00> : vector<16x128xf32>
    %18 = tpu.matmul %16, %17, %cst_14 {dimension_numbers = #tpu.dot_dimension_numbers<[1], [0], [0], [1], [0, 0, 1, 1], [], []>} : vector<16x512xbf16>, vector<512x128xbf16>, vector<16x128xf32> -> vector<16x128xf32>
    %c0_15 = arith.constant 0 : index
    %c0_16 = arith.constant 0 : index
    %19 = vector.load %arg7[%c0_15, %c0_16] : memref<1x128xf32, #tpu.memory_space<vmem>>, vector<1x128xf32>
    %20 = vector.broadcast %19 : vector<1x128xf32> to vector<16x128xf32>
    %21 = arith.addf %18, %20 : vector<16x128xf32>
    %22 = arith.truncf %21 : vector<16x128xf32> to vector<16x128xbf16>
    %c0_17 = arith.constant 0 : index
    %c0_18 = arith.constant 0 : index
    %23 = vector.load %arg8[%c0_17, %c0_18] : memref<16x128xbf16, #tpu.memory_space<vmem>>, vector<16x128xbf16>
    tpu.vector_store %arg8[%c0_17, %c0_18], %22 {strides = array<i32>} : memref<16x128xbf16, #tpu.memory_space<vmem>>, vector<16x128xbf16>,
    return
  }
  func.func @transform_0(%arg0: i32) -> (i32, i32) {
    %c0_i32 = arith.constant 0 : i32
    %c0_i32_0 = arith.constant 0 : i32
    return %arg0, %c0_i32 : i32, i32
  }
  func.func @transform_1(%arg0: i32) -> (i32, i32) {
    %c0_i32 = arith.constant 0 : i32
    %c0_i32_0 = arith.constant 0 : i32
    %c0_i32_1 = arith.constant 0 : i32
    return %c0_i32, %c0_i32_0 : i32, i32
  }
  func.func @transform_2(%arg0: i32) -> (i32, i32) {
    %c0_i32 = arith.constant 0 : i32
    %c0_i32_0 = arith.constant 0 : i32
    %c0_i32_1 = arith.constant 0 : i32
    return %c0_i32, %c0_i32_0 : i32, i32
  }
  func.func @transform_3(%arg0: i32) -> (i32, i32) {
    %c0_i32 = arith.constant 0 : i32
    %c0_i32_0 = arith.constant 0 : i32
    %c0_i32_1 = arith.constant 0 : i32
    return %c0_i32, %c0_i32_0 : i32, i32
  }
  func.func @transform_4(%arg0: i32) -> (i32, i32) {
    %c0_i32 = arith.constant 0 : i32
    %c0_i32_0 = arith.constant 0 : i32
    %c0_i32_1 = arith.constant 0 : i32
    return %c0_i32, %c0_i32_0 : i32, i32
  }
  func.func @transform_5(%arg0: i32) -> (i32, i32) {
    %c0_i32 = arith.constant 0 : i32
    %c0_i32_0 = arith.constant 0 : i32
    %c0_i32_1 = arith.constant 0 : i32
    return %c0_i32, %c0_i32_0 : i32, i32
  }
  func.func @transform_6(%arg0: i32) -> (i32, i32) {
    %c0_i32 = arith.constant 0 : i32
    %c0_i32_0 = arith.constant 0 : i32
    %c0_i32_1 = arith.constant 0 : i32
    return %c0_i32, %c0_i32_0 : i32, i32
  }
  func.func @transform_7(%arg0: i32) -> (i32, i32) {
    %c0_i32 = arith.constant 0 : i32
    %c0_i32_0 = arith.constant 0 : i32
    return %arg0, %c0_i32 : i32, i32
  }
}

</mosaic_0001>

<bundles_post_ra>
// kernel: neural_network_forward.2
= control target key start
LH: loop header
LB: loop body
LE: loop exit
PB: predicated region body
PF: predicated region fallthrough
CT: control target
= control target key end

     0   :  { %s4506_s0 = inlined_call_operand.hbm [shape: bf16[784,512], index: 0, kind: input, shape index: {}]   ;;  %s4507_s1 = inlined_call_operand.vmem [shape: f32[1,512], index: 1, kind: input, shape index: {}]   ;;  %s4508_s2 = inlined_call_operand.hbm [shape: bf16[512,512], index: 2, kind: input, shape index: {}]   ;;  %s4509_s3 = inlined_call_operand.vmem [shape: f32[1,512], index: 3, kind: input, shape index: {}]   ;;  %s4510_s4 = inlined_call_operand.vmem [shape: bf16[512,128], index: 4, kind: input, shape index: {}]   ;;  %s4511_s5 = inlined_call_operand.vmem [shape: f32[1,128], index: 5, kind: input, shape index: {}]   ;;  %s4512_s6 = inlined_call_operand.vmem [shape: bf16[8,784], index: 6, kind: input, shape index: {}]   ;;  %s4513_s7 = inlined_call_operand.<no memory space> [shape: bf16[], index: 7, kind: input, shape index: {}]   ;;  %s4514_s8 = inlined_call_operand.vmem [shape: bf16[16,128], index: 8, kind: output, shape index: {}]  }
   0x1   :  { %v13_v0 = vstv %s4513_s7 }
   0x2   :  { %v4312_v1 = vunpack.i.l.bf16 %v13_v0 }
   0x3   :  { %18 = vsyncpa [#allocation8], 0 }
   0x4   :  { %19 = vsyncpa [#allocation10], 0  ;;  %s4259_s29 = smov [#allocation7]   ;;  %s4211_s11 = scalar_lea.hbm %s4506_s0, 25088 }
   0x5   :  { %s27_s30 = sshll.u32 %s4259_s29, 4  ;;  %p4212_p0 = scmp.ne.s32.totalorder %s4506_s0, %s4211_s11  ;;  %s28_s30 = int_to_ptr.vmem [resolvable:$true] %s27_s30 }
   0x6   :  { %p4215_p1 = scmp.lt.u32.totalorder %s4211_s11, %s4506_s0 }
   0x8   :  { %p4217_p2 = pnand %p4215_p1, %p4212_p0 }
   0xa   :  { %4220 = shalt.err (!%p4217_p2)
}
   0xb   :  { %s4221_s7 = scalar_lea.vmem %s28_s30, 25088  ;;  %p4226_p4 = scmp.lt.s32.totalorder %s28_s30, %s28_s30 }
   0xc   :  { %p4222_p3 = scmp.ne.s32.totalorder %s28_s30, %s4221_s7  ;;  %p4227_p5 = scmp.lt.s32.totalorder %s4221_s7, %s4221_s7 }
   0xe   :  { %p4228_p6 = por %p4227_p5, %p4226_p4 }
  0x10   :  { %p4229_p7 = pnand %p4228_p6, %p4222_p3 }
  0x12   :  { %4232 = shalt.err (!%p4229_p7)
}
  0x13   :  { %s4260_s16 = smov 256   ;;  %s4261_s17 = smov 16  }
  0x14   :  { %33 = dma.hbm_to_vmem [thread:$0]  %s4506_s0, 25088, %s28_s30, [#allocation8], %s4260_s16, %s4260_s16, %s4261_s17  }
  0x15   :  { %s4262_s20 = smov [#allocation9]   ;;  %s4233_s24 = scalar_lea.hbm %s4508_s2, 16384 }
  0x16   :  { %s41_s21 = sshll.u32 %s4262_s20, 4  ;;  %p4234_p8 = scmp.ne.s32.totalorder %s4508_s2, %s4233_s24  ;;  %s42_s21 = int_to_ptr.vmem [resolvable:$true] %s41_s21 }
  0x17   :  { %p4237_p9 = scmp.lt.u32.totalorder %s4233_s24, %s4508_s2 }
  0x19   :  { %p4239_p10 = pnand %p4237_p9, %p4234_p8 }
  0x1b   :  { %4242 = shalt.err (!%p4239_p10)
}
  0x1c   :  { %s4243_s29 = scalar_lea.vmem %s42_s21, 16384  ;;  %p4248_p12 = scmp.lt.s32.totalorder %s42_s21, %s42_s21 }
  0x1d   :  { %p4244_p11 = scmp.ne.s32.totalorder %s42_s21, %s4243_s29  ;;  %p4249_p13 = scmp.lt.s32.totalorder %s4243_s29, %s4243_s29 }
  0x1f   :  { %p4250_p0 = por %p4249_p13, %p4248_p12 }
  0x21   :  { %p4251_p1 = pnand %p4250_p0, %p4244_p11 }
  0x23   :  { %4254 = shalt.err (!%p4251_p1)
}
  0x24   :  { %47 = dma.hbm_to_vmem [thread:$0]  %s4508_s2, 16384, %s42_s21, [#allocation10], %s4260_s16, %s4260_s16, %s4261_s17  }
  0x25   :  { %4255 = dma.done.wait [#allocation8], 25088  }
  0x26   :  { %4256 = vsyncadd [#allocation8], 4294942208 }
  0x27   :  { %4257 = dma.done.wait [#allocation10], 16384  }
  0x28   :  { %4258 = vsyncadd [#allocation10], 4294950912  ;;  %v3571_v2 = vpack.c.bf16 %v4312_v1, %v4312_v1  ;;  %v3687_v3 = vld [vmem:[#allocation7 + $0x4] ss:$16 sps:$4 sm:$0xff]   ;;  %v3689_v4 = vld [vmem:[#allocation7 + $0xc] ss:$16 sps:$4 sm:$0xff]   ;;  %v203_v39 = vlaneseq }
  0x29   :  { %1486 = vmatprep.subr.bf16.mxu0 %v3687_v3  ;;  %v3691_v5 = vld [vmem:[#allocation7] ss:$16 sps:$4 sm:$0xff]   ;;  %v3692_v6 = vld [vmem:[#allocation7 + $0x8] ss:$16 sps:$4 sm:$0xff]   ;;  %1658 = vmatprep.subr.bf16.mxu1 %v3689_v4  ;;  %v3693_v7 = vld [vmem:[#allocation7 + $0x24] ss:$16 sps:$4 sm:$0xff]  }
  0x2a   :  { %3572 = vst [vmem:[#allocation11 + $0x20] sm:$0xff] %v3571_v2   ;;  %3577 = vst [vmem:[#allocation11 + $0x28] sm:$0xff] %v3571_v2   ;;  %1487 = vmatpush1.bf16.msra.mxu0 %v3691_v5  ;;  %1659 = vmatpush1.bf16.msra.mxu1 %v3692_v6  ;;  %v3695_v8 = vld [vmem:[#allocation7 + $0x2c] ss:$16 sps:$4 sm:$0xff]   ;;  %v3697_v9 = vld [vmem:[#allocation7 + $0x20] ss:$16 sps:$4 sm:$0xff]  }
  0x2b   :  { %3582 = vst [vmem:[#allocation11 + $0x30] sm:$0xff] %v3571_v2   ;;  %1488 = vmatprep.subr.bf16.mxu0 %v3693_v7  ;;  %v3698_v10 = vld [vmem:[#allocation7 + $0x28] ss:$16 sps:$4 sm:$0xff]   ;;  %1660 = vmatprep.subr.bf16.mxu1 %v3695_v8  ;;  %v3699_v11 = vld [vmem:[#allocation7 + $0x44] ss:$16 sps:$4 sm:$0xff]   ;;  %v204_v43 = vand.u32 127, %v203_v39 }
  0x2c   :  { %v3701_v12 = vld [vmem:[#allocation7 + $0x4c] ss:$16 sps:$4 sm:$0xff]   ;;  %v3703_v13 = vld [vmem:[#allocation7 + $0x40] ss:$16 sps:$4 sm:$0xff]   ;;  %v3704_v14 = vld [vmem:[#allocation7 + $0x48] ss:$16 sps:$4 sm:$0xff]  }
  0x2d   :  { %v3705_v15 = vld [vmem:[#allocation7 + $0x64] ss:$16 sps:$4 sm:$0xff]   ;;  %v3707_v16 = vld [vmem:[#allocation7 + $0x6c] ss:$16 sps:$4 sm:$0xff]   ;;  %v3709_v17 = vld [vmem:[#allocation7 + $0x60] ss:$16 sps:$4 sm:$0xff]  }
  0x2e   :  { %1489 = vmatpush1.bf16.msra.mxu0 %v3697_v9  ;;  %1661 = vmatpush1.bf16.msra.mxu1 %v3698_v10  ;;  %v3710_v18 = vld [vmem:[#allocation7 + $0x68] ss:$16 sps:$4 sm:$0xff]   ;;  %v3711_v19 = vld [vmem:[#allocation7 + $0x84] ss:$16 sps:$4 sm:$0xff]   ;;  %v3713_v20 = vld [vmem:[#allocation7 + $0x8c] ss:$16 sps:$4 sm:$0xff]  }
  0x2f   :  { %1490 = vmatprep.subr.bf16.mxu0 %v3699_v11  ;;  %1662 = vmatprep.subr.bf16.mxu1 %v3701_v12  ;;  %v3715_v21 = vld [vmem:[#allocation7 + $0x80] ss:$16 sps:$4 sm:$0xff]   ;;  %v3716_v22 = vld [vmem:[#allocation7 + $0x88] ss:$16 sps:$4 sm:$0xff]   ;;  %v3717_v23 = vld [vmem:[#allocation7 + $0xa4] ss:$16 sps:$4 sm:$0xff]  }
  0x30   :  { %v3719_v24 = vld [vmem:[#allocation7 + $0xac] ss:$16 sps:$4 sm:$0xff]   ;;  %v3721_v25 = vld [vmem:[#allocation7 + $0xa0] ss:$16 sps:$4 sm:$0xff]   ;;  %v3722_v26 = vld [vmem:[#allocation7 + $0xa8] ss:$16 sps:$4 sm:$0xff]  }
  0x31   :  { %v3723_v27 = vld [vmem:[#allocation7 + $0xc4] ss:$16 sps:$4 sm:$0xff]   ;;  %v3725_v28 = vld [vmem:[#allocation7 + $0xcc] ss:$16 sps:$4 sm:$0xff]   ;;  %v3727_v29 = vld [vmem:[#allocation7 + $0xc0] ss:$16 sps:$4 sm:$0xff]  }
  0x32   :  { %1491 = vmatpush1.bf16.msra.mxu0 %v3703_v13  ;;  %1663 = vmatpush1.bf16.msra.mxu1 %v3704_v14  ;;  %v3728_v30 = vld [vmem:[#allocation7 + $0xc8] ss:$16 sps:$4 sm:$0xff]   ;;  %v3729_v31 = vld [vmem:[#allocation7 + $0xe4] ss:$16 sps:$4 sm:$0xff]   ;;  %v3731_v32 = vld [vmem:[#allocation7 + $0xec] ss:$16 sps:$4 sm:$0xff]  }
  0x33   :  { %1492 = vmatprep.subr.bf16.mxu0 %v3705_v15  ;;  %1664 = vmatprep.subr.bf16.mxu1 %v3707_v16  ;;  %v3733_v33 = vld [vmem:[#allocation7 + $0xe0] ss:$16 sps:$4 sm:$0xff]   ;;  %v3734_v34 = vld [vmem:[#allocation7 + $0xe8] ss:$16 sps:$4 sm:$0xff]   ;;  %v3735_v35 = vld [vmem:[#allocation7 + $0x104] ss:$16 sps:$4 sm:$0xff]  }
  0x34   :  { %v3737_v36 = vld [vmem:[#allocation7 + $0x10c] ss:$16 sps:$4 sm:$0xff]   ;;  %v3739_v37 = vld [vmem:[#allocation7 + $0x100] ss:$16 sps:$4 sm:$0xff]   ;;  %v3740_v38 = vld [vmem:[#allocation7 + $0x108] ss:$16 sps:$4 sm:$0xff]  }
  0x35   :  { %v3741_v40 = vld [vmem:[#allocation7 + $0x124] ss:$16 sps:$4 sm:$0xff]   ;;  %v3743_v41 = vld [vmem:[#allocation7 + $0x12c] ss:$16 sps:$4 sm:$0xff]   ;;  %v3745_v42 = vld [vmem:[#allocation7 + $0x120] ss:$16 sps:$4 sm:$0xff]  }
  0x36   :  { %1493 = vmatpush1.bf16.msra.mxu0 %v3709_v17  ;;  %1665 = vmatpush1.bf16.msra.mxu1 %v3710_v18  ;;  %v3746_v44 = vld [vmem:[#allocation7 + $0x128] ss:$16 sps:$4 sm:$0xff]   ;;  %v3747_v45 = vld [vmem:[#allocation7 + $0x144] ss:$16 sps:$4 sm:$0xff]   ;;  %v3749_v46 = vld [vmem:[#allocation7 + $0x14c] ss:$16 sps:$4 sm:$0xff]  }
  0x37   :  { %1494 = vmatprep.subr.bf16.mxu0 %v3711_v19  ;;  %1666 = vmatprep.subr.bf16.mxu1 %v3713_v20  ;;  %v3751_v47 = vld [vmem:[#allocation7 + $0x140] ss:$16 sps:$4 sm:$0xff]   ;;  %v3752_v48 = vld [vmem:[#allocation7 + $0x148] ss:$16 sps:$4 sm:$0xff]   ;;  %v205_v49 = vadd.s32 768, %v204_v43  ;;  %vm1482_vm1 = vcmask 130048  }
  0x38   :  { %v3753_v50 = vld [vmem:[#allocation7 + $0x164] ss:$16 sps:$4 sm:$0xff]   ;;  %v3755_v51 = vld [vmem:[#allocation7 + $0x16c] ss:$16 sps:$4 sm:$0xff]   ;;  %v3182_v53 = vld [vmem:[%s4512_s6 + $0x18] sm:$0xf] }
  0x39   :  { %v69_v52 = vld [vmem:[%s4512_s6] sm:$0xff]   ;;  %vm206_vm0 = vcmp.lt.s32.totalorder %v205_v49, 784  ;;  %v3758_v55 = vld [vmem:[#allocation7 + $0x168] ss:$16 sps:$4 sm:$0xff]   ;;  %v201_v56 = vunpack.c.l.bf16 %v3182_v53  ;;  %v3761_v58 = vld [vmem:[#allocation7 + $0x18c] ss:$16 sps:$4 sm:$0xff]  }
  0x3a   :  { %1495 = vmatpush1.bf16.msra.mxu0 %v3715_v21  ;;  %1667 = vmatpush1.bf16.msra.mxu1 %v3716_v22  ;;  %79 = vst [vmem:[#allocation11] sm:$0xff] %v69_v52   ;;  %v3757_v54 = vld [vmem:[#allocation7 + $0x160] ss:$16 sps:$4 sm:$0xff]   ;;  %v3759_v57 = vld [vmem:[#allocation7 + $0x184] ss:$16 sps:$4 sm:$0xff]  }
  0x3b   :  { %1496 = vmatprep.subr.bf16.mxu0 %v3717_v23  ;;  %1668 = vmatprep.subr.bf16.mxu1 %v3719_v24  ;;  %v207_v59 = vsel %vm206_vm0, %v201_v56, %v4312_v1  ;;  %v3763_v61 = vld [vmem:[#allocation7 + $0x180] ss:$16 sps:$4 sm:$0xff]   ;;  %v3764_v62 = vld [vmem:[#allocation7 + $0x188] ss:$16 sps:$4 sm:$0xff]   ;;  %v3765_v63 = vld [vmem:[#allocation7 + $0x1a4] ss:$16 sps:$4 sm:$0xff]  }
  0x3c   :  { %v3566_v60 = vpack.c.bf16 %v4312_v1, %v207_v59  ;;  %v3767_v0 = vld [vmem:[#allocation7 + $0x1ac] ss:$16 sps:$4 sm:$0xff]   ;;  %v3769_v2 = vld [vmem:[#allocation7 + $0x1a0] ss:$16 sps:$4 sm:$0xff]   ;;  %v3770_v3 = vld [vmem:[#allocation7 + $0x1a8] ss:$16 sps:$4 sm:$0xff]  }
  0x3d   :  { %v3771_v4 = vld [vmem:[#allocation7 + $0x1c4] ss:$16 sps:$4 sm:$0xff]   ;;  %v3773_v5 = vld [vmem:[#allocation7 + $0x1cc] ss:$16 sps:$4 sm:$0xff]   ;;  %v3775_v6 = vld [vmem:[#allocation7 + $0x1c0] ss:$16 sps:$4 sm:$0xff]  }
  0x3e   :  { %1497 = vmatpush1.bf16.msra.mxu0 %v3721_v25  ;;  %1669 = vmatpush1.bf16.msra.mxu1 %v3722_v26  ;;  %3567 = vst [vmem:[#allocation11 + $0x18] sm:$0xff] %v3566_v60   ;;  %v3776_v1 = vld [vmem:[#allocation7 + $0x1c8] ss:$16 sps:$4 sm:$0xff]   ;;  %v3777_v8 = vld [vmem:[#allocation7 + $0x1e4] ss:$16 sps:$4 sm:$0xff]  }
  0x3f   :  { %1498 = vmatprep.subr.bf16.mxu0 %v3723_v27  ;;  %1670 = vmatprep.subr.bf16.mxu1 %v3725_v28  ;;  %v3779_v9 = vld [vmem:[#allocation7 + $0x1ec] ss:$16 sps:$4 sm:$0xff]   ;;  %v3781_v10 = vld [vmem:[#allocation7 + $0x1e0] ss:$16 sps:$4 sm:$0xff]   ;;  %v3782_v11 = vld [vmem:[#allocation7 + $0x1e8] ss:$16 sps:$4 sm:$0xff]  }
  0x40   :  { %v3788_v12 = vld [vmem:[#allocation7 + $0x204] ss:$16 sps:$4 sm:$0xff]   ;;  %v3791_v13 = vld [vmem:[#allocation7 + $0x20c] ss:$16 sps:$4 sm:$0xff]   ;;  %v3786_v15 = vld [vmem:[#allocation7 + $0x200] ss:$16 sps:$4 sm:$0xff]  }
  0x41   :  { %v3785_v7 = vld [vmem:[#allocation11 + $0x4] ss:$28 sps:$4 sm:$0xff]   ;;  %v3789_v16 = vld [vmem:[#allocation7 + $0x208] ss:$16 sps:$4 sm:$0xff]   ;;  %v3797_v18 = vld [vmem:[#allocation7 + $0x22c] ss:$16 sps:$4 sm:$0xff]  }
  0x42   :  { %1499 = vmatpush1.bf16.msra.mxu0 %v3727_v29  ;;  %1671 = vmatpush1.bf16.msra.mxu1 %v3728_v30  ;;  %v3794_v17 = vld [vmem:[#allocation7 + $0x224] ss:$16 sps:$4 sm:$0xff]   ;;  %v3792_v19 = vld [vmem:[#allocation7 + $0x220] ss:$16 sps:$4 sm:$0xff]   ;;  %v3795_v20 = vld [vmem:[#allocation7 + $0x228] ss:$16 sps:$4 sm:$0xff]  }
  0x43   :  { %1500 = vmatprep.subr.bf16.mxu0 %v3729_v31  ;;  %1672 = vmatprep.subr.bf16.mxu1 %v3731_v32  ;;  %v3800_v21 = vld [vmem:[#allocation7 + $0x244] ss:$16 sps:$4 sm:$0xff]   ;;  %v3803_v22 = vld [vmem:[#allocation7 + $0x24c] ss:$16 sps:$4 sm:$0xff]   ;;  %v3798_v23 = vld [vmem:[#allocation7 + $0x240] ss:$16 sps:$4 sm:$0xff]  }
  0x44   :  { %1518 = vmatprep.mubr.bf16.mxu0 %v3785_v7  ;;  %1690 = vmatprep.mubr.bf16.mxu1 %v3785_v7  ;;  %v3801_v24 = vld [vmem:[#allocation7 + $0x248] ss:$16 sps:$4 sm:$0xff]   ;;  %v3806_v25 = vld [vmem:[#allocation7 + $0x264] ss:$16 sps:$4 sm:$0xff]   ;;  %v3809_v26 = vld [vmem:[#allocation7 + $0x26c] ss:$16 sps:$4 sm:$0xff]  }
  0x45   :  { %v3783_v14 = vld [vmem:[#allocation11] ss:$28 sps:$4 sm:$0xff]   ;;  %v3807_v28 = vld [vmem:[#allocation7 + $0x268] ss:$16 sps:$4 sm:$0xff]   ;;  %v3812_v29 = vld [vmem:[#allocation7 + $0x284] ss:$16 sps:$4 sm:$0xff]  }
  0x46   :  { %1501 = vmatpush1.bf16.msra.mxu0 %v3733_v33  ;;  %1673 = vmatpush1.bf16.msra.mxu1 %v3734_v34  ;;  %v3804_v27 = vld [vmem:[#allocation7 + $0x260] ss:$16 sps:$4 sm:$0xff]   ;;  %v3815_v30 = vld [vmem:[#allocation7 + $0x28c] ss:$16 sps:$4 sm:$0xff]   ;;  %v3813_v32 = vld [vmem:[#allocation7 + $0x288] ss:$16 sps:$4 sm:$0xff]  }
  0x47   :  { %1502 = vmatprep.subr.bf16.mxu0 %v3735_v35  ;;  %1674 = vmatprep.subr.bf16.mxu1 %v3737_v36  ;;  %v3810_v31 = vld [vmem:[#allocation7 + $0x280] ss:$16 sps:$4 sm:$0xff]   ;;  %v3818_v33 = vld [vmem:[#allocation7 + $0x2a4] ss:$16 sps:$4 sm:$0xff]   ;;  %v3821_v34 = vld [vmem:[#allocation7 + $0x2ac] ss:$16 sps:$4 sm:$0xff]  }
  0x48   :  { %v3816_v35 = vld [vmem:[#allocation7 + $0x2a0] ss:$16 sps:$4 sm:$0xff]   ;;  %v3819_v36 = vld [vmem:[#allocation7 + $0x2a8] ss:$16 sps:$4 sm:$0xff]   ;;  %v3836_v49 = vld [vmem:[#allocation7 + $0x304] ss:$16 sps:$4 sm:$0xff]  }
  0x49   :  { %v4354_v43 = vld [vmem:[#allocation11 + $0x24] sm:$0xff]  ;;  %v3846_v59 = vld [vmem:[#allocation7 + $0x340] ss:$16 sps:$4 sm:$0xff]  }
  0x4a   :  { %1503 = vmatpush1.bf16.msra.mxu0 %v3739_v37  ;;  %1675 = vmatpush1.bf16.msra.mxu1 %v3740_v38  ;;  %v3824_v37 = vld [vmem:[#allocation7 + $0x2c4] ss:$16 sps:$4 sm:$0xff]   ;;  %v3827_v38 = vld [vmem:[#allocation7 + $0x2cc] ss:$16 sps:$4 sm:$0xff]   ;;  %v3837_v52 = vld [vmem:[#allocation7 + $0x308] ss:$16 sps:$4 sm:$0xff]  }
  0x4b   :  { %1504 = vmatprep.subr.bf16.mxu0 %v3741_v40  ;;  %1676 = vmatprep.subr.bf16.mxu1 %v3743_v41  ;;  %v3822_v40 = vld [vmem:[#allocation7 + $0x2c0] ss:$16 sps:$4 sm:$0xff]   ;;  %v3825_v41 = vld [vmem:[#allocation7 + $0x2c8] ss:$16 sps:$4 sm:$0xff]   ;;  %v3842_v53 = vld [vmem:[#allocation7 + $0x324] ss:$16 sps:$4 sm:$0xff]  }
  0x4c   :  { %v3843_v56 = vld [vmem:[#allocation7 + $0x328] ss:$16 sps:$4 sm:$0xff]   ;;  %v3864_v7 = vld [vmem:[#allocation7 + $0x3a0] ss:$16 sps:$4 sm:$0xff]  }
  0x4d   :  { %v3849_v60 = vld [vmem:[#allocation7 + $0x348] ss:$16 sps:$4 sm:$0xff]  }
  0x4e   :  { %1505 = vmatpush1.bf16.msra.mxu0 %v3745_v42  ;;  %1677 = vmatpush1.bf16.msra.mxu1 %v3746_v44  ;;  %v4352_v42 = vld [vmem:[%s4512_s6 + $0x8] sm:$0xff]   ;;  %v3830_v44 = vld [vmem:[#allocation7 + $0x2e4] ss:$16 sps:$4 sm:$0xff]  }
  0x4f   :  { %1506 = vmatprep.subr.bf16.mxu0 %v3747_v45  ;;  %1678 = vmatprep.subr.bf16.mxu1 %v3749_v46  ;;  %v3833_v45 = vld [vmem:[#allocation7 + $0x2ec] ss:$16 sps:$4 sm:$0xff]   ;;  %v3186_v46 = vcombine.high %v4352_v42, %v4354_v43 }
  0x52   :  { %1507 = vmatpush1.bf16.msra.mxu0 %v3751_v47  ;;  %1679 = vmatpush1.bf16.msra.mxu1 %v3752_v48  ;;  %v3828_v47 = vld [vmem:[#allocation7 + $0x2e0] ss:$16 sps:$4 sm:$0xff]   ;;  %v3831_v48 = vld [vmem:[#allocation7 + $0x2e8] ss:$16 sps:$4 sm:$0xff]  }
  0x53   :  { %1508 = vmatprep.subr.bf16.mxu0 %v3753_v50  ;;  %1680 = vmatprep.subr.bf16.mxu1 %v3755_v51  ;;  %v3839_v50 = vld [vmem:[#allocation7 + $0x30c] ss:$16 sps:$4 sm:$0xff]   ;;  %v3834_v51 = vld [vmem:[#allocation7 + $0x300] ss:$16 sps:$4 sm:$0xff]  }
  0x56   :  { %1509 = vmatpush1.bf16.msra.mxu0 %v3757_v54  ;;  %1681 = vmatpush1.bf16.msra.mxu1 %v3758_v55  ;;  %v3845_v54 = vld [vmem:[#allocation7 + $0x32c] ss:$16 sps:$4 sm:$0xff]   ;;  %v3840_v55 = vld [vmem:[#allocation7 + $0x320] ss:$16 sps:$4 sm:$0xff]  }
  0x57   :  { %1510 = vmatprep.subr.bf16.mxu0 %v3759_v57  ;;  %1682 = vmatprep.subr.bf16.mxu1 %v3761_v58  ;;  %v3848_v57 = vld [vmem:[#allocation7 + $0x344] ss:$16 sps:$4 sm:$0xff]   ;;  %v3851_v58 = vld [vmem:[#allocation7 + $0x34c] ss:$16 sps:$4 sm:$0xff]  }
  0x5a   :  { %1511 = vmatpush1.bf16.msra.mxu0 %v3763_v61  ;;  %1683 = vmatpush1.bf16.msra.mxu1 %v3764_v62  ;;  %v3854_v61 = vld [vmem:[#allocation7 + $0x364] ss:$16 sps:$4 sm:$0xff]   ;;  %v3857_v62 = vld [vmem:[#allocation7 + $0x36c] ss:$16 sps:$4 sm:$0xff]  }
  0x5b   :  { %1512 = vmatprep.subr.bf16.mxu0 %v3765_v63  ;;  %1684 = vmatprep.subr.bf16.mxu1 %v3767_v0  ;;  %v3852_v63 = vld [vmem:[#allocation7 + $0x360] ss:$16 sps:$4 sm:$0xff]   ;;  %v3855_v0 = vld [vmem:[#allocation7 + $0x368] ss:$16 sps:$4 sm:$0xff]  }
  0x5e   :  { %1513 = vmatpush1.bf16.msra.mxu0 %v3769_v2  ;;  %1685 = vmatpush1.bf16.msra.mxu1 %v3770_v3  ;;  %v3860_v2 = vld [vmem:[#allocation7 + $0x384] ss:$16 sps:$4 sm:$0xff]   ;;  %v3863_v3 = vld [vmem:[#allocation7 + $0x38c] ss:$16 sps:$4 sm:$0xff]  }
  0x5f   :  { %1514 = vmatprep.subr.bf16.mxu0 %v3771_v4  ;;  %1686 = vmatprep.subr.bf16.mxu1 %v3773_v5  ;;  %v3858_v4 = vld [vmem:[#allocation7 + $0x380] ss:$16 sps:$4 sm:$0xff]   ;;  %v3861_v5 = vld [vmem:[#allocation7 + $0x388] ss:$16 sps:$4 sm:$0xff]  }
  0x62   :  { %1515 = vmatpush1.bf16.msra.mxu0 %v3775_v6  ;;  %1687 = vmatpush1.bf16.msra.mxu1 %v3776_v1  ;;  %v3866_v6 = vld [vmem:[#allocation7 + $0x3a4] ss:$16 sps:$4 sm:$0xff]   ;;  %v3869_v1 = vld [vmem:[#allocation7 + $0x3ac] ss:$16 sps:$4 sm:$0xff]  }
  0x63   :  { %1516 = vmatprep.subr.bf16.mxu0 %v3777_v8  ;;  %1688 = vmatprep.subr.bf16.mxu1 %v3779_v9  ;;  %v3867_v8 = vld [vmem:[#allocation7 + $0x3a8] ss:$16 sps:$4 sm:$0xff]   ;;  %v3872_v9 = vld [vmem:[#allocation7 + $0x3c4] ss:$16 sps:$4 sm:$0xff]  }
  0x66   :  { %1517 = vmatpush1.bf16.msra.mxu0 %v3781_v10  ;;  %1689 = vmatpush1.bf16.msra.mxu1 %v3782_v11  ;;  %v3875_v10 = vld [vmem:[#allocation7 + $0x3cc] ss:$16 sps:$4 sm:$0xff]   ;;  %v3870_v11 = vld [vmem:[#allocation7 + $0x3c0] ss:$16 sps:$4 sm:$0xff]  }
  0x67   :  { %1529 = vmatprep.subr.bf16.mxu0 %v3788_v12  ;;  %1701 = vmatprep.subr.bf16.mxu1 %v3791_v13  ;;  %v3873_v12 = vld [vmem:[#allocation7 + $0x3c8] ss:$16 sps:$4 sm:$0xff]   ;;  %v3878_v13 = vld [vmem:[#allocation7 + $0x3e4] ss:$16 sps:$4 sm:$0xff]  }
  0x69   :  { %1519 = vmatmul.mubr.bf16.vlgmr.msra.gmra.mrb[0].mxu0 %v3783_v14  ;;  %1691 = vmatmul.mubr.bf16.vlgmr.msra.gmra.mrb[0].mxu1 %v3783_v14  ;;  %v3881_v14 = vld [vmem:[#allocation7 + $0x3ec] ss:$16 sps:$4 sm:$0xff]  }
  0x6a   :  { %1530 = vmatpush1.bf16.msra.mxu0 %v3786_v15  ;;  %1702 = vmatpush1.bf16.msra.mxu1 %v3789_v16  ;;  %v3876_v15 = vld [vmem:[#allocation7 + $0x3e0] ss:$16 sps:$4 sm:$0xff]   ;;  %v3879_v16 = vld [vmem:[#allocation7 + $0x3e8] ss:$16 sps:$4 sm:$0xff]  }
  0x6b   :  { %1531 = vmatprep.subr.bf16.mxu0 %v3794_v17  ;;  %1703 = vmatprep.subr.bf16.mxu1 %v3797_v18  ;;  %v3885_v17 = vld [vmem:[#allocation7 + $0x404] ss:$16 sps:$4 sm:$0xff]   ;;  %v3888_v18 = vld [vmem:[#allocation7 + $0x40c] ss:$16 sps:$4 sm:$0xff]  }
  0x6c   :  { %1561 = vmatprep.mubr.bf16.mxu0 %v3186_v46  ;;  %1733 = vmatprep.mubr.bf16.mxu1 %v3186_v46  ;;  %v3921_v46 = vld [vmem:[#allocation7 + $0x4c4] ss:$16 sps:$4 sm:$0xff]  }
  0x6e   :  { %1532 = vmatpush1.bf16.msra.mxu0 %v3792_v19  ;;  %1704 = vmatpush1.bf16.msra.mxu1 %v3795_v20  ;;  %v3185_v19 = vcombine.low %v4352_v42, %v4354_v43  ;;  %v3883_v20 = vld [vmem:[#allocation7 + $0x400] ss:$16 sps:$4 sm:$0xff]   ;;  %v3915_v42 = vld [vmem:[#allocation7 + $0x4a4] ss:$16 sps:$4 sm:$0xff]   ;;  %v3918_v43 = vld [vmem:[#allocation7 + $0x4ac] ss:$16 sps:$4 sm:$0xff]  }
  0x6f   :  { %1533 = vmatprep.subr.bf16.mxu0 %v3800_v21  ;;  %1705 = vmatprep.subr.bf16.mxu1 %v3803_v22  ;;  %v3886_v21 = vld [vmem:[#allocation7 + $0x408] ss:$16 sps:$4 sm:$0xff]   ;;  %v3891_v22 = vld [vmem:[#allocation7 + $0x424] ss:$16 sps:$4 sm:$0xff]  }
  0x72   :  { %1534 = vmatpush1.bf16.msra.mxu0 %v3798_v23  ;;  %1706 = vmatpush1.bf16.msra.mxu1 %v3801_v24  ;;  %v3894_v23 = vld [vmem:[#allocation7 + $0x42c] ss:$16 sps:$4 sm:$0xff]   ;;  %v3889_v24 = vld [vmem:[#allocation7 + $0x420] ss:$16 sps:$4 sm:$0xff]  }
  0x73   :  { %1535 = vmatprep.subr.bf16.mxu0 %v3806_v25  ;;  %1707 = vmatprep.subr.bf16.mxu1 %v3809_v26  ;;  %v3892_v25 = vld [vmem:[#allocation7 + $0x428] ss:$16 sps:$4 sm:$0xff]   ;;  %v4363_v26 = vld [vmem:[%s4512_s6 + $0x10] sm:$0xff]  }
  0x76   :  { %1536 = vmatpush1.bf16.msra.mxu0 %v3804_v27  ;;  %1708 = vmatpush1.bf16.msra.mxu1 %v3807_v28  ;;  %v4365_v27 = vld [vmem:[#allocation11 + $0x2c] sm:$0xff]  ;;  %v3897_v28 = vld [vmem:[#allocation7 + $0x444] ss:$16 sps:$4 sm:$0xff]  }
  0x77   :  { %1537 = vmatprep.subr.bf16.mxu0 %v3812_v29  ;;  %1709 = vmatprep.subr.bf16.mxu1 %v3815_v30  ;;  %v3900_v29 = vld [vmem:[#allocation7 + $0x44c] ss:$16 sps:$4 sm:$0xff]   ;;  %v3188_v30 = vcombine.high %v4363_v26, %v4365_v27 }
  0x7a   :  { %1538 = vmatpush1.bf16.msra.mxu0 %v3810_v31  ;;  %1710 = vmatpush1.bf16.msra.mxu1 %v3813_v32  ;;  %v3895_v31 = vld [vmem:[#allocation7 + $0x440] ss:$16 sps:$4 sm:$0xff]   ;;  %v3898_v32 = vld [vmem:[#allocation7 + $0x448] ss:$16 sps:$4 sm:$0xff]  }
  0x7b   :  { %1539 = vmatprep.subr.bf16.mxu0 %v3818_v33  ;;  %1711 = vmatprep.subr.bf16.mxu1 %v3821_v34  ;;  %v3903_v33 = vld [vmem:[#allocation7 + $0x464] ss:$16 sps:$4 sm:$0xff]   ;;  %v3906_v34 = vld [vmem:[#allocation7 + $0x46c] ss:$16 sps:$4 sm:$0xff]  }
  0x7e   :  { %1540 = vmatpush1.bf16.msra.mxu0 %v3816_v35  ;;  %1712 = vmatpush1.bf16.msra.mxu1 %v3819_v36  ;;  %v3901_v35 = vld [vmem:[#allocation7 + $0x460] ss:$16 sps:$4 sm:$0xff]   ;;  %v3904_v36 = vld [vmem:[#allocation7 + $0x468] ss:$16 sps:$4 sm:$0xff]  }
  0x7f   :  { %1541 = vmatprep.subr.bf16.mxu0 %v3824_v37  ;;  %1713 = vmatprep.subr.bf16.mxu1 %v3827_v38  ;;  %v3909_v37 = vld [vmem:[#allocation7 + $0x484] ss:$16 sps:$4 sm:$0xff]   ;;  %v3912_v38 = vld [vmem:[#allocation7 + $0x48c] ss:$16 sps:$4 sm:$0xff]  }
  0x82   :  { %1542 = vmatpush1.bf16.msra.mxu0 %v3822_v40  ;;  %1714 = vmatpush1.bf16.msra.mxu1 %v3825_v41  ;;  %v3907_v40 = vld [vmem:[#allocation7 + $0x480] ss:$16 sps:$4 sm:$0xff]   ;;  %v3910_v41 = vld [vmem:[#allocation7 + $0x488] ss:$16 sps:$4 sm:$0xff]  }
  0x83   :  { %1543 = vmatprep.subr.bf16.mxu0 %v3830_v44  ;;  %1715 = vmatprep.subr.bf16.mxu1 %v3833_v45  ;;  %v3913_v44 = vld [vmem:[#allocation7 + $0x4a0] ss:$16 sps:$4 sm:$0xff]   ;;  %v3916_v45 = vld [vmem:[#allocation7 + $0x4a8] ss:$16 sps:$4 sm:$0xff]  }
  0x86   :  { %1544 = vmatpush1.bf16.msra.mxu0 %v3828_v47  ;;  %1716 = vmatpush1.bf16.msra.mxu1 %v3831_v48  ;;  %v3924_v47 = vld [vmem:[#allocation7 + $0x4cc] ss:$16 sps:$4 sm:$0xff]   ;;  %v3919_v48 = vld [vmem:[#allocation7 + $0x4c0] ss:$16 sps:$4 sm:$0xff]  }
  0x87   :  { %1545 = vmatprep.subr.bf16.mxu0 %v3836_v49  ;;  %1717 = vmatprep.subr.bf16.mxu1 %v3839_v50  ;;  %v3922_v49 = vld [vmem:[#allocation7 + $0x4c8] ss:$16 sps:$4 sm:$0xff]   ;;  %v3927_v50 = vld [vmem:[#allocation7 + $0x4e4] ss:$16 sps:$4 sm:$0xff]  }
  0x8a   :  { %1546 = vmatpush1.bf16.msra.mxu0 %v3834_v51  ;;  %1718 = vmatpush1.bf16.msra.mxu1 %v3837_v52  ;;  %v3930_v51 = vld [vmem:[#allocation7 + $0x4ec] ss:$16 sps:$4 sm:$0xff]   ;;  %v3925_v52 = vld [vmem:[#allocation7 + $0x4e0] ss:$16 sps:$4 sm:$0xff]  }
  0x8b   :  { %1547 = vmatprep.subr.bf16.mxu0 %v3842_v53  ;;  %1719 = vmatprep.subr.bf16.mxu1 %v3845_v54  ;;  %v3928_v53 = vld [vmem:[#allocation7 + $0x4e8] ss:$16 sps:$4 sm:$0xff]   ;;  %v3933_v54 = vld [vmem:[#allocation7 + $0x504] ss:$16 sps:$4 sm:$0xff]  }
  0x8e   :  { %1548 = vmatpush1.bf16.msra.mxu0 %v3840_v55  ;;  %1720 = vmatpush1.bf16.msra.mxu1 %v3843_v56  ;;  %v3936_v55 = vld [vmem:[#allocation7 + $0x50c] ss:$16 sps:$4 sm:$0xff]   ;;  %v3931_v56 = vld [vmem:[#allocation7 + $0x500] ss:$16 sps:$4 sm:$0xff]  }
  0x8f   :  { %1549 = vmatprep.subr.bf16.mxu0 %v3848_v57  ;;  %1721 = vmatprep.subr.bf16.mxu1 %v3851_v58  ;;  %v3934_v57 = vld [vmem:[#allocation7 + $0x508] ss:$16 sps:$4 sm:$0xff]   ;;  %v3939_v58 = vld [vmem:[#allocation7 + $0x524] ss:$16 sps:$4 sm:$0xff]  }
  0x92   :  { %1550 = vmatpush1.bf16.msra.mxu0 %v3846_v59  ;;  %1722 = vmatpush1.bf16.msra.mxu1 %v3849_v60  ;;  %v3942_v59 = vld [vmem:[#allocation7 + $0x52c] ss:$16 sps:$4 sm:$0xff]   ;;  %v3937_v60 = vld [vmem:[#allocation7 + $0x520] ss:$16 sps:$4 sm:$0xff]  }
  0x93   :  { %1551 = vmatprep.subr.bf16.mxu0 %v3854_v61  ;;  %1723 = vmatprep.subr.bf16.mxu1 %v3857_v62  ;;  %v3940_v61 = vld [vmem:[#allocation7 + $0x528] ss:$16 sps:$4 sm:$0xff]   ;;  %v3945_v62 = vld [vmem:[#allocation7 + $0x544] ss:$16 sps:$4 sm:$0xff]  }
  0x96   :  { %1552 = vmatpush1.bf16.msra.mxu0 %v3852_v63  ;;  %1724 = vmatpush1.bf16.msra.mxu1 %v3855_v0  ;;  %v3948_v63 = vld [vmem:[#allocation7 + $0x54c] ss:$16 sps:$4 sm:$0xff]   ;;  %v3943_v0 = vld [vmem:[#allocation7 + $0x540] ss:$16 sps:$4 sm:$0xff]  }
  0x97   :  { %1553 = vmatprep.subr.bf16.mxu0 %v3860_v2  ;;  %1725 = vmatprep.subr.bf16.mxu1 %v3863_v3  ;;  %v3946_v2 = vld [vmem:[#allocation7 + $0x548] ss:$16 sps:$4 sm:$0xff]   ;;  %v3951_v3 = vld [vmem:[#allocation7 + $0x564] ss:$16 sps:$4 sm:$0xff]  }
  0x9a   :  { %1554 = vmatpush1.bf16.msra.mxu0 %v3858_v4  ;;  %1726 = vmatpush1.bf16.msra.mxu1 %v3861_v5  ;;  %v3954_v4 = vld [vmem:[#allocation7 + $0x56c] ss:$16 sps:$4 sm:$0xff]   ;;  %v3949_v5 = vld [vmem:[#allocation7 + $0x560] ss:$16 sps:$4 sm:$0xff]  }
  0x9b   :  { %1555 = vmatprep.subr.bf16.mxu0 %v3866_v6  ;;  %1727 = vmatprep.subr.bf16.mxu1 %v3869_v1  ;;  %v3952_v6 = vld [vmem:[#allocation7 + $0x568] ss:$16 sps:$4 sm:$0xff]   ;;  %v3957_v1 = vld [vmem:[#allocation7 + $0x584] ss:$16 sps:$4 sm:$0xff]  }
  0x9e   :  { %1556 = vmatpush1.bf16.msra.mxu0 %v3864_v7  ;;  %1728 = vmatpush1.bf16.msra.mxu1 %v3867_v8  ;;  %v3960_v7 = vld [vmem:[#allocation7 + $0x58c] ss:$16 sps:$4 sm:$0xff]   ;;  %v3955_v8 = vld [vmem:[#allocation7 + $0x580] ss:$16 sps:$4 sm:$0xff]  }
  0x9f   :  { %1557 = vmatprep.subr.bf16.mxu0 %v3872_v9  ;;  %1729 = vmatprep.subr.bf16.mxu1 %v3875_v10  ;;  %v3958_v9 = vld [vmem:[#allocation7 + $0x588] ss:$16 sps:$4 sm:$0xff]   ;;  %v3963_v10 = vld [vmem:[#allocation7 + $0x5a4] ss:$16 sps:$4 sm:$0xff]  }
  0xa2   :  { %1558 = vmatpush1.bf16.msra.mxu0 %v3870_v11  ;;  %1730 = vmatpush1.bf16.msra.mxu1 %v3873_v12  ;;  %v3966_v11 = vld [vmem:[#allocation7 + $0x5ac] ss:$16 sps:$4 sm:$0xff]   ;;  %v3961_v12 = vld [vmem:[#allocation7 + $0x5a0] ss:$16 sps:$4 sm:$0xff]  }
  0xa3   :  { %1559 = vmatprep.subr.bf16.mxu0 %v3878_v13  ;;  %1731 = vmatprep.subr.bf16.mxu1 %v3881_v14  ;;  %v3964_v13 = vld [vmem:[#allocation7 + $0x5a8] ss:$16 sps:$4 sm:$0xff]   ;;  %v3969_v14 = vld [vmem:[#allocation7 + $0x5c4] ss:$16 sps:$4 sm:$0xff]  }
  0xa6   :  { %1560 = vmatpush1.bf16.msra.mxu0 %v3876_v15  ;;  %1732 = vmatpush1.bf16.msra.mxu1 %v3879_v16  ;;  %v3972_v15 = vld [vmem:[#allocation7 + $0x5cc] ss:$16 sps:$4 sm:$0xff]   ;;  %v3967_v16 = vld [vmem:[#allocation7 + $0x5c0] ss:$16 sps:$4 sm:$0xff]  }
  0xa7   :  { %1572 = vmatprep.subr.bf16.mxu0 %v3885_v17  ;;  %1744 = vmatprep.subr.bf16.mxu1 %v3888_v18  ;;  %v3970_v17 = vld [vmem:[#allocation7 + $0x5c8] ss:$16 sps:$4 sm:$0xff]   ;;  %v3975_v18 = vld [vmem:[#allocation7 + $0x5e4] ss:$16 sps:$4 sm:$0xff]  }
  0xa9   :  { %1562 = vmatmul.mubr.bf16.vlgmr.msra.gmra.mrb[0].mxu0 %v3185_v19  ;;  %1734 = vmatmul.mubr.bf16.vlgmr.msra.gmra.mrb[0].mxu1 %v3185_v19  ;;  %v3978_v19 = vld [vmem:[#allocation7 + $0x5ec] ss:$16 sps:$4 sm:$0xff]  }
  0xaa   :  { %1573 = vmatpush1.bf16.msra.mxu0 %v3883_v20  ;;  %1745 = vmatpush1.bf16.msra.mxu1 %v3886_v21  ;;  %v3973_v20 = vld [vmem:[#allocation7 + $0x5e0] ss:$16 sps:$4 sm:$0xff]   ;;  %v3976_v21 = vld [vmem:[#allocation7 + $0x5e8] ss:$16 sps:$4 sm:$0xff]  }
  0xab   :  { %1574 = vmatprep.subr.bf16.mxu0 %v3891_v22  ;;  %1746 = vmatprep.subr.bf16.mxu1 %v3894_v23  ;;  %v3982_v22 = vld [vmem:[#allocation7 + $0x604] ss:$16 sps:$4 sm:$0xff]   ;;  %v3985_v23 = vld [vmem:[#allocation7 + $0x60c] ss:$16 sps:$4 sm:$0xff]  }
  0xac   :  { %1604 = vmatprep.mubr.bf16.mxu0 %v3188_v30  ;;  %1776 = vmatprep.mubr.bf16.mxu1 %v3188_v30  ;;  %v3992_v30 = vld [vmem:[#allocation9 + $0xc] ss:$16 sps:$4 sm:$0xff]  }
  0xae   :  { %1575 = vmatpush1.bf16.msra.mxu0 %v3889_v24  ;;  %1747 = vmatpush1.bf16.msra.mxu1 %v3892_v25  ;;  %v3980_v24 = vld [vmem:[#allocation7 + $0x600] ss:$16 sps:$4 sm:$0xff]   ;;  %v3983_v25 = vld [vmem:[#allocation7 + $0x608] ss:$16 sps:$4 sm:$0xff]  }
  0xaf   :  { %1576 = vmatprep.subr.bf16.mxu0 %v3897_v28  ;;  %1748 = vmatprep.subr.bf16.mxu1 %v3900_v29  ;;  %v3187_v28 = vcombine.low %v4363_v26, %v4365_v27  ;;  %v3989_v29 = vld [vmem:[#allocation9 + $0x4] ss:$16 sps:$4 sm:$0xff]   ;;  %v3998_v27 = vld [vmem:[#allocation9 + $0x2c] ss:$16 sps:$4 sm:$0xff]  }
  0xb0   :  { %v3995_v26 = vld [vmem:[#allocation9 + $0x24] ss:$16 sps:$4 sm:$0xff]  }
  0xb2   :  { %1577 = vmatpush1.bf16.msra.mxu0 %v3895_v31  ;;  %1749 = vmatpush1.bf16.msra.mxu1 %v3898_v32  ;;  %v4263_v31 = vmov 0   ;;  %v3986_v32 = vld [vmem:[#allocation11 + $0x18] ss:$28 sps:$4 sm:$0xff]  }
  0xb3   :  { %1578 = vmatprep.subr.bf16.mxu0 %v3903_v33  ;;  %1750 = vmatprep.subr.bf16.mxu1 %v3906_v34  ;;  %v3987_v33 = vld [vmem:[#allocation9] ss:$16 sps:$4 sm:$0xff]   ;;  %v3990_v34 = vld [vmem:[#allocation9 + $0x8] ss:$16 sps:$4 sm:$0xff]  }
  0xb6   :  { %1579 = vmatpush1.bf16.msra.mxu0 %v3901_v35  ;;  %1751 = vmatpush1.bf16.msra.mxu1 %v3904_v36  ;;  %v3993_v35 = vld [vmem:[#allocation9 + $0x20] ss:$16 sps:$4 sm:$0xff]   ;;  %v3996_v36 = vld [vmem:[#allocation9 + $0x28] ss:$16 sps:$4 sm:$0xff]  }
  0xb7   :  { %1580 = vmatprep.subr.bf16.mxu0 %v3909_v37  ;;  %1752 = vmatprep.subr.bf16.mxu1 %v3912_v38  ;;  %v4001_v37 = vld [vmem:[#allocation9 + $0x44] ss:$16 sps:$4 sm:$0xff]   ;;  %v4004_v38 = vld [vmem:[#allocation9 + $0x4c] ss:$16 sps:$4 sm:$0xff]  }
  0xba   :  { %1581 = vmatpush1.bf16.msra.mxu0 %v3907_v40  ;;  %1753 = vmatpush1.bf16.msra.mxu1 %v3910_v41  ;;  %v3999_v40 = vld [vmem:[#allocation9 + $0x40] ss:$16 sps:$4 sm:$0xff]   ;;  %v4002_v41 = vld [vmem:[#allocation9 + $0x48] ss:$16 sps:$4 sm:$0xff]  }
  0xbb   :  { %1582 = vmatprep.subr.bf16.mxu0 %v3915_v42  ;;  %1754 = vmatprep.subr.bf16.mxu1 %v3918_v43  ;;  %v4007_v42 = vld [vmem:[#allocation9 + $0x64] ss:$16 sps:$4 sm:$0xff]   ;;  %v4010_v43 = vld [vmem:[#allocation9 + $0x6c] ss:$16 sps:$4 sm:$0xff]  }
  0xbe   :  { %1583 = vmatpush1.bf16.msra.mxu0 %v3913_v44  ;;  %1755 = vmatpush1.bf16.msra.mxu1 %v3916_v45  ;;  %v4005_v44 = vld [vmem:[#allocation9 + $0x60] ss:$16 sps:$4 sm:$0xff]   ;;  %v4008_v45 = vld [vmem:[#allocation9 + $0x68] ss:$16 sps:$4 sm:$0xff]  }
  0xbf   :  { %1584 = vmatprep.subr.bf16.mxu0 %v3921_v46  ;;  %1756 = vmatprep.subr.bf16.mxu1 %v3924_v47  ;;  %v4013_v46 = vld [vmem:[#allocation9 + $0x84] ss:$16 sps:$4 sm:$0xff]   ;;  %v4016_v47 = vld [vmem:[#allocation9 + $0x8c] ss:$16 sps:$4 sm:$0xff]  }
  0xc2   :  { %1585 = vmatpush1.bf16.msra.mxu0 %v3919_v48  ;;  %1757 = vmatpush1.bf16.msra.mxu1 %v3922_v49  ;;  %v4011_v48 = vld [vmem:[#allocation9 + $0x80] ss:$16 sps:$4 sm:$0xff]   ;;  %v4014_v49 = vld [vmem:[#allocation9 + $0x88] ss:$16 sps:$4 sm:$0xff]  }
  0xc3   :  { %1586 = vmatprep.subr.bf16.mxu0 %v3927_v50  ;;  %1758 = vmatprep.subr.bf16.mxu1 %v3930_v51  ;;  %v4019_v50 = vld [vmem:[#allocation9 + $0xa4] ss:$16 sps:$4 sm:$0xff]   ;;  %v4022_v51 = vld [vmem:[#allocation9 + $0xac] ss:$16 sps:$4 sm:$0xff]  }
  0xc6   :  { %1587 = vmatpush1.bf16.msra.mxu0 %v3925_v52  ;;  %1759 = vmatpush1.bf16.msra.mxu1 %v3928_v53  ;;  %v4017_v52 = vld [vmem:[#allocation9 + $0xa0] ss:$16 sps:$4 sm:$0xff]   ;;  %v4020_v53 = vld [vmem:[#allocation9 + $0xa8] ss:$16 sps:$4 sm:$0xff]  }
  0xc7   :  { %1588 = vmatprep.subr.bf16.mxu0 %v3933_v54  ;;  %1760 = vmatprep.subr.bf16.mxu1 %v3936_v55  ;;  %v4025_v54 = vld [vmem:[#allocation9 + $0xc4] ss:$16 sps:$4 sm:$0xff]   ;;  %v4028_v55 = vld [vmem:[#allocation9 + $0xcc] ss:$16 sps:$4 sm:$0xff]  }
  0xca   :  { %1589 = vmatpush1.bf16.msra.mxu0 %v3931_v56  ;;  %1761 = vmatpush1.bf16.msra.mxu1 %v3934_v57  ;;  %v4023_v56 = vld [vmem:[#allocation9 + $0xc0] ss:$16 sps:$4 sm:$0xff]   ;;  %v4026_v57 = vld [vmem:[#allocation9 + $0xc8] ss:$16 sps:$4 sm:$0xff]  }
  0xcb   :  { %1590 = vmatprep.subr.bf16.mxu0 %v3939_v58  ;;  %1762 = vmatprep.subr.bf16.mxu1 %v3942_v59  ;;  %v4031_v58 = vld [vmem:[#allocation9 + $0xe4] ss:$16 sps:$4 sm:$0xff]   ;;  %v4034_v59 = vld [vmem:[#allocation9 + $0xec] ss:$16 sps:$4 sm:$0xff]  }
  0xce   :  { %1591 = vmatpush1.bf16.msra.mxu0 %v3937_v60  ;;  %1763 = vmatpush1.bf16.msra.mxu1 %v3940_v61  ;;  %v4029_v60 = vld [vmem:[#allocation9 + $0xe0] ss:$16 sps:$4 sm:$0xff]   ;;  %v4032_v61 = vld [vmem:[#allocation9 + $0xe8] ss:$16 sps:$4 sm:$0xff]  }
  0xcf   :  { %1592 = vmatprep.subr.bf16.mxu0 %v3945_v62  ;;  %1764 = vmatprep.subr.bf16.mxu1 %v3948_v63  ;;  %v4037_v62 = vld [vmem:[#allocation9 + $0x104] ss:$16 sps:$4 sm:$0xff]   ;;  %v4040_v63 = vld [vmem:[#allocation9 + $0x10c] ss:$16 sps:$4 sm:$0xff]  }
  0xd2   :  { %1593 = vmatpush1.bf16.msra.mxu0 %v3943_v0  ;;  %1765 = vmatpush1.bf16.msra.mxu1 %v3946_v2  ;;  %v4035_v0 = vld [vmem:[#allocation9 + $0x100] ss:$16 sps:$4 sm:$0xff]   ;;  %v4038_v2 = vld [vmem:[#allocation9 + $0x108] ss:$16 sps:$4 sm:$0xff]  }
  0xd3   :  { %1594 = vmatprep.subr.bf16.mxu0 %v3951_v3  ;;  %1766 = vmatprep.subr.bf16.mxu1 %v3954_v4  ;;  %v4043_v3 = vld [vmem:[#allocation9 + $0x124] ss:$16 sps:$4 sm:$0xff]   ;;  %v4046_v4 = vld [vmem:[#allocation9 + $0x12c] ss:$16 sps:$4 sm:$0xff]  }
  0xd6   :  { %1595 = vmatpush1.bf16.msra.mxu0 %v3949_v5  ;;  %1767 = vmatpush1.bf16.msra.mxu1 %v3952_v6  ;;  %v4041_v5 = vld [vmem:[#allocation9 + $0x120] ss:$16 sps:$4 sm:$0xff]   ;;  %v4044_v6 = vld [vmem:[#allocation9 + $0x128] ss:$16 sps:$4 sm:$0xff]  }
  0xd7   :  { %1596 = vmatprep.subr.bf16.mxu0 %v3957_v1  ;;  %1768 = vmatprep.subr.bf16.mxu1 %v3960_v7  ;;  %v4049_v1 = vld [vmem:[#allocation9 + $0x144] ss:$16 sps:$4 sm:$0xff]   ;;  %v4052_v7 = vld [vmem:[#allocation9 + $0x14c] ss:$16 sps:$4 sm:$0xff]  }
  0xda   :  { %1597 = vmatpush1.bf16.msra.mxu0 %v3955_v8  ;;  %1769 = vmatpush1.bf16.msra.mxu1 %v3958_v9  ;;  %v4047_v8 = vld [vmem:[#allocation9 + $0x140] ss:$16 sps:$4 sm:$0xff]   ;;  %v4050_v9 = vld [vmem:[#allocation9 + $0x148] ss:$16 sps:$4 sm:$0xff]  }
  0xdb   :  { %1598 = vmatprep.subr.bf16.mxu0 %v3963_v10  ;;  %1770 = vmatprep.subr.bf16.mxu1 %v3966_v11  ;;  %v4055_v10 = vld [vmem:[#allocation9 + $0x164] ss:$16 sps:$4 sm:$0xff]   ;;  %v4058_v11 = vld [vmem:[#allocation9 + $0x16c] ss:$16 sps:$4 sm:$0xff]  }
  0xde   :  { %1599 = vmatpush1.bf16.msra.mxu0 %v3961_v12  ;;  %1771 = vmatpush1.bf16.msra.mxu1 %v3964_v13  ;;  %v4053_v12 = vld [vmem:[#allocation9 + $0x160] ss:$16 sps:$4 sm:$0xff]   ;;  %v4056_v13 = vld [vmem:[#allocation9 + $0x168] ss:$16 sps:$4 sm:$0xff]  }
  0xdf   :  { %1600 = vmatprep.subr.bf16.mxu0 %v3969_v14  ;;  %1772 = vmatprep.subr.bf16.mxu1 %v3972_v15  ;;  %v4061_v14 = vld [vmem:[#allocation9 + $0x184] ss:$16 sps:$4 sm:$0xff]   ;;  %v4064_v15 = vld [vmem:[#allocation9 + $0x18c] ss:$16 sps:$4 sm:$0xff]  }
  0xe2   :  { %1601 = vmatpush1.bf16.msra.mxu0 %v3967_v16  ;;  %1773 = vmatpush1.bf16.msra.mxu1 %v3970_v17  ;;  %v4059_v16 = vld [vmem:[#allocation9 + $0x180] ss:$16 sps:$4 sm:$0xff]   ;;  %v4062_v17 = vld [vmem:[#allocation9 + $0x188] ss:$16 sps:$4 sm:$0xff]  }
  0xe3   :  { %1602 = vmatprep.subr.bf16.mxu0 %v3975_v18  ;;  %1774 = vmatprep.subr.bf16.mxu1 %v3978_v19  ;;  %v4067_v18 = vld [vmem:[#allocation9 + $0x1a4] ss:$16 sps:$4 sm:$0xff]   ;;  %v4070_v19 = vld [vmem:[#allocation9 + $0x1ac] ss:$16 sps:$4 sm:$0xff]  }
  0xe6   :  { %1603 = vmatpush1.bf16.msra.mxu0 %v3973_v20  ;;  %1775 = vmatpush1.bf16.msra.mxu1 %v3976_v21  ;;  %v4065_v20 = vld [vmem:[#allocation9 + $0x1a0] ss:$16 sps:$4 sm:$0xff]   ;;  %v4068_v21 = vld [vmem:[#allocation9 + $0x1a8] ss:$16 sps:$4 sm:$0xff]  }
  0xe7   :  { %1615 = vmatprep.subr.bf16.mxu0 %v3982_v22  ;;  %1787 = vmatprep.subr.bf16.mxu1 %v3985_v23  ;;  %v4073_v22 = vld [vmem:[#allocation9 + $0x1c4] ss:$16 sps:$4 sm:$0xff]   ;;  %v4076_v23 = vld [vmem:[#allocation9 + $0x1cc] ss:$16 sps:$4 sm:$0xff]  }
  0xe9   :  { %1605 = vmatmul.mubr.bf16.vlgmr.msra.gmra.mrb[0].mxu0 %v3187_v28  ;;  %1777 = vmatmul.mubr.bf16.vlgmr.msra.gmra.mrb[0].mxu1 %v3187_v28  ;;  %v4079_v28 = vld [vmem:[#allocation9 + $0x1e4] ss:$16 sps:$4 sm:$0xff]  }
  0xea   :  { %1616 = vmatpush1.bf16.msra.mxu0 %v3980_v24  ;;  %1788 = vmatpush1.bf16.msra.mxu1 %v3983_v25  ;;  %v4071_v24 = vld [vmem:[#allocation9 + $0x1c0] ss:$16 sps:$4 sm:$0xff]   ;;  %v4074_v25 = vld [vmem:[#allocation9 + $0x1c8] ss:$16 sps:$4 sm:$0xff]  }
  0xeb   :  { %1647 = vmatprep.mubr.bf16.mxu0 %v4263_v31  ;;  %1819 = vmatprep.mubr.bf16.mxu1 %v4263_v31  ;;  %v4080_v31 = vld [vmem:[#allocation9 + $0x1e8] ss:$16 sps:$4 sm:$0xff]  }
  0xec   :  { %2632 = vmatprep.subr.bf16.mxu0 %v3989_v29  ;;  %2718 = vmatprep.subr.bf16.mxu1 %v3992_v30  ;;  %v4082_v29 = vld [vmem:[#allocation9 + $0x1ec] ss:$16 sps:$4 sm:$0xff]   ;;  %v4077_v30 = vld [vmem:[#allocation9 + $0x1e0] ss:$16 sps:$4 sm:$0xff]  }
  0xf5   :  { %3386 = vmatmul.mubr.msk.bf16.vlgmr.msra.gmra.mrb[0].mxu0 %vm1482_vm1, %v3986_v32  ;;  %3387 = vmatmul.mubr.msk.bf16.vlgmr.msra.gmra.mrb[0].mxu1 %vm1482_vm1, %v3986_v32  ;;  %v4085_v32 = vld [vmem:[#allocation9 + $0x204] ss:$16 sps:$4 sm:$0xff]  }
  0xf6   :  { %2633 = vmatpush1.bf16.msra.mxu0 %v3987_v33  ;;  %2719 = vmatpush1.bf16.msra.mxu1 %v3990_v34  ;;  %v4088_v33 = vld [vmem:[#allocation9 + $0x20c] ss:$16 sps:$4 sm:$0xff]   ;;  %v4372_v34 = vshrl.u32 %v203_v39, 7 }
  0xf7   :  { %2634 = vmatprep.subr.bf16.mxu0 %v3995_v26  ;;  %2720 = vmatprep.subr.bf16.mxu1 %v3998_v27 }
  0xf8   :  { %v449_v26 = vsub.s32 0, %v4372_v34  ;;  %v457_v27 = vsub.s32 2, %v4372_v34 }
  0xfa   :  { %2635 = vmatpush1.bf16.msra.mxu0 %v3993_v35  ;;  %2721 = vmatpush1.bf16.msra.mxu1 %v3996_v36  ;;  %v445_v35 = vld [vmem:[%s4507_s1] sm:$0xf]  ;;  %v453_v36 = vsub.s32 1, %v4372_v34 }
  0xfb   :  { %2636 = vmatprep.subr.bf16.mxu0 %v4001_v37  ;;  %2722 = vmatprep.subr.bf16.mxu1 %v4004_v38  ;;  %v461_v37 = vsub.s32 3, %v4372_v34  ;;  %v450_v38 = vrot.slane %v445_v35, %v449_v26 }
  0xfc   :  { %v454_v39 = vrot.slane %v445_v35, %v453_v36 }
  0xfe   :  { %2637 = vmatpush1.bf16.msra.mxu0 %v3999_v40  ;;  %2723 = vmatpush1.bf16.msra.mxu1 %v4002_v41  ;;  %v458_v40 = vrot.slane %v445_v35, %v457_v27  ;;  %v462_v41 = vrot.slane %v445_v35, %v461_v37  ;;  %v4127_v35 = vld [vmem:[#allocation9 + $0x2e4] ss:$16 sps:$4 sm:$0xff]  }
  0xff   :  { %2638 = vmatprep.subr.bf16.mxu0 %v4007_v42  ;;  %2724 = vmatprep.subr.bf16.mxu1 %v4010_v43 }
 0x102   :  { %2639 = vmatpush1.bf16.msra.mxu0 %v4005_v44  ;;  %2725 = vmatpush1.bf16.msra.mxu1 %v4008_v45 }
 0x103   :  { %2640 = vmatprep.subr.bf16.mxu0 %v4013_v46  ;;  %2726 = vmatprep.subr.bf16.mxu1 %v4016_v47 }
 0x106   :  { %2641 = vmatpush1.bf16.msra.mxu0 %v4011_v48  ;;  %2727 = vmatpush1.bf16.msra.mxu1 %v4014_v49 }
 0x107   :  { %2642 = vmatprep.subr.bf16.mxu0 %v4019_v50  ;;  %2728 = vmatprep.subr.bf16.mxu1 %v4022_v51 }
 0x10a   :  { %2643 = vmatpush1.bf16.msra.mxu0 %v4017_v52  ;;  %2729 = vmatpush1.bf16.msra.mxu1 %v4020_v53 }
 0x10b   :  { %2644 = vmatprep.subr.bf16.mxu0 %v4025_v54  ;;  %2730 = vmatprep.subr.bf16.mxu1 %v4028_v55 }
 0x10e   :  { %2645 = vmatpush1.bf16.msra.mxu0 %v4023_v56  ;;  %2731 = vmatpush1.bf16.msra.mxu1 %v4026_v57 }
 0x10f   :  { %2646 = vmatprep.subr.bf16.mxu0 %v4031_v58  ;;  %2732 = vmatprep.subr.bf16.mxu1 %v4034_v59 }
 0x112   :  { %2647 = vmatpush1.bf16.msra.mxu0 %v4029_v60  ;;  %2733 = vmatpush1.bf16.msra.mxu1 %v4032_v61 }
 0x113   :  { %2648 = vmatprep.subr.bf16.mxu0 %v4037_v62  ;;  %2734 = vmatprep.subr.bf16.mxu1 %v4040_v63 }
 0x116   :  { %2649 = vmatpush1.bf16.msra.mxu0 %v4035_v0  ;;  %2735 = vmatpush1.bf16.msra.mxu1 %v4038_v2 }
 0x117   :  { %2650 = vmatprep.subr.bf16.mxu0 %v4043_v3  ;;  %2736 = vmatprep.subr.bf16.mxu1 %v4046_v4 }
 0x11a   :  { %2651 = vmatpush1.bf16.msra.mxu0 %v4041_v5  ;;  %2737 = vmatpush1.bf16.msra.mxu1 %v4044_v6 }
 0x11b   :  { %2652 = vmatprep.subr.bf16.mxu0 %v4049_v1  ;;  %2738 = vmatprep.subr.bf16.mxu1 %v4052_v7  ;;  %v4083_v1 = vld [vmem:[#allocation9 + $0x200] ss:$16 sps:$4 sm:$0xff]   ;;  %v4086_v7 = vld [vmem:[#allocation9 + $0x208] ss:$16 sps:$4 sm:$0xff]  }
 0x11e   :  { %2653 = vmatpush1.bf16.msra.mxu0 %v4047_v8  ;;  %2739 = vmatpush1.bf16.msra.mxu1 %v4050_v9  ;;  %v4091_v8 = vld [vmem:[#allocation9 + $0x224] ss:$16 sps:$4 sm:$0xff]   ;;  %v4094_v9 = vld [vmem:[#allocation9 + $0x22c] ss:$16 sps:$4 sm:$0xff]  }
 0x11f   :  { %2654 = vmatprep.subr.bf16.mxu0 %v4055_v10  ;;  %2740 = vmatprep.subr.bf16.mxu1 %v4058_v11  ;;  %v4089_v10 = vld [vmem:[#allocation9 + $0x220] ss:$16 sps:$4 sm:$0xff]   ;;  %v4092_v11 = vld [vmem:[#allocation9 + $0x228] ss:$16 sps:$4 sm:$0xff]  }
 0x122   :  { %2655 = vmatpush1.bf16.msra.mxu0 %v4053_v12  ;;  %2741 = vmatpush1.bf16.msra.mxu1 %v4056_v13  ;;  %v4097_v12 = vld [vmem:[#allocation9 + $0x244] ss:$16 sps:$4 sm:$0xff]   ;;  %v4100_v13 = vld [vmem:[#allocation9 + $0x24c] ss:$16 sps:$4 sm:$0xff]  }
 0x123   :  { %2656 = vmatprep.subr.bf16.mxu0 %v4061_v14  ;;  %2742 = vmatprep.subr.bf16.mxu1 %v4064_v15  ;;  %v4095_v14 = vld [vmem:[#allocation9 + $0x240] ss:$16 sps:$4 sm:$0xff]   ;;  %v4098_v15 = vld [vmem:[#allocation9 + $0x248] ss:$16 sps:$4 sm:$0xff]  }
 0x126   :  { %2657 = vmatpush1.bf16.msra.mxu0 %v4059_v16  ;;  %2743 = vmatpush1.bf16.msra.mxu1 %v4062_v17  ;;  %v4103_v16 = vld [vmem:[#allocation9 + $0x264] ss:$16 sps:$4 sm:$0xff]   ;;  %v4106_v17 = vld [vmem:[#allocation9 + $0x26c] ss:$16 sps:$4 sm:$0xff]  }
 0x127   :  { %2658 = vmatprep.subr.bf16.mxu0 %v4067_v18  ;;  %2744 = vmatprep.subr.bf16.mxu1 %v4070_v19  ;;  %v4101_v18 = vld [vmem:[#allocation9 + $0x260] ss:$16 sps:$4 sm:$0xff]   ;;  %v4104_v19 = vld [vmem:[#allocation9 + $0x268] ss:$16 sps:$4 sm:$0xff]  }
 0x12a   :  { %2659 = vmatpush1.bf16.msra.mxu0 %v4065_v20  ;;  %2745 = vmatpush1.bf16.msra.mxu1 %v4068_v21  ;;  %v4109_v20 = vld [vmem:[#allocation9 + $0x284] ss:$16 sps:$4 sm:$0xff]   ;;  %v4112_v21 = vld [vmem:[#allocation9 + $0x28c] ss:$16 sps:$4 sm:$0xff]  }
 0x12b   :  { %2660 = vmatprep.subr.bf16.mxu0 %v4073_v22  ;;  %2746 = vmatprep.subr.bf16.mxu1 %v4076_v23  ;;  %v4107_v22 = vld [vmem:[#allocation9 + $0x280] ss:$16 sps:$4 sm:$0xff]   ;;  %v4110_v23 = vld [vmem:[#allocation9 + $0x288] ss:$16 sps:$4 sm:$0xff]  }
 0x12e   :  { %2661 = vmatpush1.bf16.msra.mxu0 %v4071_v24  ;;  %2747 = vmatpush1.bf16.msra.mxu1 %v4074_v25  ;;  %v4115_v24 = vld [vmem:[#allocation9 + $0x2a4] ss:$16 sps:$4 sm:$0xff]   ;;  %v4118_v25 = vld [vmem:[#allocation9 + $0x2ac] ss:$16 sps:$4 sm:$0xff]  }
 0x12f   :  { %2662 = vmatprep.subr.bf16.mxu0 %v4079_v28  ;;  %2748 = vmatprep.subr.bf16.mxu1 %v4082_v29  ;;  %v4113_v28 = vld [vmem:[#allocation9 + $0x2a0] ss:$16 sps:$4 sm:$0xff]   ;;  %v4116_v29 = vld [vmem:[#allocation9 + $0x2a8] ss:$16 sps:$4 sm:$0xff]  }
 0x132   :  { %2663 = vmatpush1.bf16.msra.mxu0 %v4077_v30  ;;  %2749 = vmatpush1.bf16.msra.mxu1 %v4080_v31  ;;  %v4121_v30 = vld [vmem:[#allocation9 + $0x2c4] ss:$16 sps:$4 sm:$0xff]   ;;  %v4124_v31 = vld [vmem:[#allocation9 + $0x2cc] ss:$16 sps:$4 sm:$0xff]  }
 0x133   :  { %2675 = vmatprep.subr.bf16.mxu0 %v4085_v32  ;;  %2761 = vmatprep.subr.bf16.mxu1 %v4088_v33  ;;  %v4119_v32 = vld [vmem:[#allocation9 + $0x2c0] ss:$16 sps:$4 sm:$0xff]   ;;  %v4122_v33 = vld [vmem:[#allocation9 + $0x2c8] ss:$16 sps:$4 sm:$0xff]  }
 0x1c8   :  { %v1649_v42 = vpop.f32.mrb[0].mxu0  ;;  %v1821_v43 = vpop.f32.mrb[0].mxu1 }
 0x1c9   :  { %v3634_v44 = vadd.f32 %v1649_v42, %v450_v38  ;;  %v3638_v45 = vadd.f32 %v1821_v43, %v458_v40  ;;  %v1651_v46 = vpop.f32.mrb[1].mxu0  ;;  %v1823_v47 = vpop.f32.mrb[1].mxu1  ;;  %v4136_v42 = vld [vmem:[#allocation9 + $0x30c] ss:$16 sps:$4 sm:$0xff]   ;;  %v4131_v43 = vld [vmem:[#allocation9 + $0x300] ss:$16 sps:$4 sm:$0xff]  }
 0x1ca   :  { %v3635_v48 = vadd.f32 %v1651_v46, %v454_v39  ;;  %v3639_v49 = vadd.f32 %v1823_v47, %v462_v41  ;;  %v1653_v50 = vpop.f32.mrb[2].mxu0  ;;  %v1825_v51 = vpop.f32.mrb[2].mxu1  ;;  %v4142_v46 = vld [vmem:[#allocation9 + $0x32c] ss:$16 sps:$4 sm:$0xff]   ;;  %v4137_v47 = vld [vmem:[#allocation9 + $0x320] ss:$16 sps:$4 sm:$0xff]  }
 0x1cb   :  { %v3636_v52 = vadd.f32 %v1653_v50, %v450_v38  ;;  %v3640_v53 = vadd.f32 %v1825_v51, %v458_v40  ;;  %v1655_v54 = vpop.f32.mrb[3].mxu0  ;;  %v1827_v55 = vpop.f32.mrb[3].mxu1  ;;  %v1830_v58 = vmax.f32 %v3634_v44, 0.0  ;;  %v1832_v59 = vmax.f32 %v3638_v45, 0.0  ;;  %v4130_v38 = vld [vmem:[#allocation9 + $0x2ec] ss:$16 sps:$4 sm:$0xff]  }
 0x1cc   :  { %v3637_v56 = vadd.f32 %v1655_v54, %v454_v39  ;;  %v3641_v57 = vadd.f32 %v1827_v55, %v462_v41  ;;  %v1831_v62 = vmax.f32 %v3635_v48, 0.0  ;;  %v1833_v63 = vmax.f32 %v3639_v49, 0.0  ;;  %v4125_v40 = vld [vmem:[#allocation9 + $0x2e0] ss:$16 sps:$4 sm:$0xff]   ;;  %v4128_v39 = vld [vmem:[#allocation9 + $0x2e8] ss:$16 sps:$4 sm:$0xff]  }
 0x1cd   :  { %v1834_v60 = vmax.f32 %v3636_v52, 0.0  ;;  %v1836_v61 = vmax.f32 %v3640_v53, 0.0  ;;  %v4133_v41 = vld [vmem:[#allocation9 + $0x304] ss:$16 sps:$4 sm:$0xff]   ;;  %v4134_v44 = vld [vmem:[#allocation9 + $0x308] ss:$16 sps:$4 sm:$0xff]  }
 0x1ce   :  { %v1835_v0 = vmax.f32 %v3637_v56, 0.0  ;;  %v1837_v2 = vmax.f32 %v3641_v57, 0.0  ;;  %v4139_v45 = vld [vmem:[#allocation9 + $0x324] ss:$16 sps:$4 sm:$0xff]   ;;  %v4140_v48 = vld [vmem:[#allocation9 + $0x328] ss:$16 sps:$4 sm:$0xff]  }
 0x1cf   :  { %v1838_v3 = vpack.c.bf16 %v1834_v60, %v1830_v58  ;;  %v4389_v4 = vpack.c.bf16 %v1836_v61, %v1832_v59  ;;  %v4145_v49 = vld [vmem:[#allocation9 + $0x344] ss:$16 sps:$4 sm:$0xff]   ;;  %v4148_v50 = vld [vmem:[#allocation9 + $0x34c] ss:$16 sps:$4 sm:$0xff]   ;;  %v4143_v51 = vld [vmem:[#allocation9 + $0x340] ss:$16 sps:$4 sm:$0xff]  }
 0x1d0   :  { %v1839_v5 = vpack.c.bf16 %v1835_v0, %v1831_v62  ;;  %v1841_v6 = vpack.c.bf16 %v1837_v2, %v1833_v63  ;;  %v4146_v52 = vld [vmem:[#allocation9 + $0x348] ss:$16 sps:$4 sm:$0xff]   ;;  %v4151_v53 = vld [vmem:[#allocation9 + $0x364] ss:$16 sps:$4 sm:$0xff]   ;;  %v4154_v54 = vld [vmem:[#allocation9 + $0x36c] ss:$16 sps:$4 sm:$0xff]  }
 0x1d1   :  { %v4149_v55 = vld [vmem:[#allocation9 + $0x360] ss:$16 sps:$4 sm:$0xff]   ;;  %v4152_v56 = vld [vmem:[#allocation9 + $0x368] ss:$16 sps:$4 sm:$0xff]   ;;  %v4157_v57 = vld [vmem:[#allocation9 + $0x384] ss:$16 sps:$4 sm:$0xff]  }
 0x1d2   :  { %2664 = vmatprep.mubr.bf16.mxu0 %v1839_v5  ;;  %2750 = vmatprep.mubr.bf16.mxu1 %v1839_v5  ;;  %v4160_v58 = vld [vmem:[#allocation9 + $0x38c] ss:$16 sps:$4 sm:$0xff]   ;;  %v4155_v59 = vld [vmem:[#allocation9 + $0x380] ss:$16 sps:$4 sm:$0xff]   ;;  %v4158_v60 = vld [vmem:[#allocation9 + $0x388] ss:$16 sps:$4 sm:$0xff]  }
 0x1d3   :  { %2665 = vmatmul.mubr.bf16.vlgmr.msra.gmra.mrb[4].mxu0 %v1838_v3  ;;  %2751 = vmatmul.mubr.bf16.vlgmr.msra.gmra.mrb[4].mxu1 %v1838_v3  ;;  %v4163_v61 = vld [vmem:[#allocation9 + $0x3a4] ss:$16 sps:$4 sm:$0xff]   ;;  %v4166_v62 = vld [vmem:[#allocation9 + $0x3ac] ss:$16 sps:$4 sm:$0xff]   ;;  %v4161_v63 = vld [vmem:[#allocation9 + $0x3a0] ss:$16 sps:$4 sm:$0xff]  }
 0x1d4   :  { %2676 = vmatpush1.bf16.msra.mxu0 %v4083_v1  ;;  %2762 = vmatpush1.bf16.msra.mxu1 %v4086_v7  ;;  %v4164_v0 = vld [vmem:[#allocation9 + $0x3a8] ss:$16 sps:$4 sm:$0xff]   ;;  %v4169_v2 = vld [vmem:[#allocation9 + $0x3c4] ss:$16 sps:$4 sm:$0xff]   ;;  %v4172_v3 = vld [vmem:[#allocation9 + $0x3cc] ss:$16 sps:$4 sm:$0xff]  }
 0x1d5   :  { %2707 = vmatprep.mubr.bf16.mxu0 %v1841_v6  ;;  %2793 = vmatprep.mubr.bf16.mxu1 %v1841_v6  ;;  %v4167_v5 = vld [vmem:[#allocation9 + $0x3c0] ss:$16 sps:$4 sm:$0xff]   ;;  %v4170_v6 = vld [vmem:[#allocation9 + $0x3c8] ss:$16 sps:$4 sm:$0xff]   ;;  %v4175_v1 = vld [vmem:[#allocation9 + $0x3e4] ss:$16 sps:$4 sm:$0xff]  }
 0x1d6   :  { %2677 = vmatprep.subr.bf16.mxu0 %v4091_v8  ;;  %2763 = vmatprep.subr.bf16.mxu1 %v4094_v9  ;;  %v4178_v7 = vld [vmem:[#allocation9 + $0x3ec] ss:$16 sps:$4 sm:$0xff]   ;;  %v4173_v8 = vld [vmem:[#allocation9 + $0x3e0] ss:$16 sps:$4 sm:$0xff]   ;;  %v4176_v9 = vld [vmem:[#allocation9 + $0x3e8] ss:$16 sps:$4 sm:$0xff]  }
 0x1d8   :  { %2678 = vmatpush1.bf16.msra.mxu0 %v4089_v10  ;;  %2764 = vmatpush1.bf16.msra.mxu1 %v4092_v11  ;;  %v4179_v10 = vld [vmem:[%s4510_s4 + $0x40] sm:$0xff]  }
 0x1d9   :  { %2679 = vmatprep.subr.bf16.mxu0 %v4097_v12  ;;  %2765 = vmatprep.subr.bf16.mxu1 %v4100_v13  ;;  %v4180_v11 = vld [vmem:[%s4510_s4 + $0xc0] sm:$0xff]  }
 0x1da   :  { %v4181_v12 = vld [vmem:[%s4510_s4] sm:$0xff]  }
 0x1db   :  { %v4182_v13 = vld [vmem:[%s4510_s4 + $0x80] sm:$0xff]  }
 0x1dc   :  { %2680 = vmatpush1.bf16.msra.mxu0 %v4095_v14  ;;  %2766 = vmatpush1.bf16.msra.mxu1 %v4098_v15  ;;  %v4183_v14 = vld [vmem:[%s4510_s4 + $0x48] sm:$0xff]  }
 0x1dd   :  { %2681 = vmatprep.subr.bf16.mxu0 %v4103_v16  ;;  %2767 = vmatprep.subr.bf16.mxu1 %v4106_v17  ;;  %v4184_v15 = vld [vmem:[%s4510_s4 + $0xc8] sm:$0xff]  }
 0x1de   :  { %v4185_v16 = vld [vmem:[%s4510_s4 + $0x8] sm:$0xff]  }
 0x1df   :  { %v4186_v17 = vld [vmem:[%s4510_s4 + $0x88] sm:$0xff]  }
 0x1e0   :  { %2682 = vmatpush1.bf16.msra.mxu0 %v4101_v18  ;;  %2768 = vmatpush1.bf16.msra.mxu1 %v4104_v19  ;;  %v4187_v18 = vld [vmem:[%s4510_s4 + $0x50] sm:$0xff]  }
 0x1e1   :  { %2683 = vmatprep.subr.bf16.mxu0 %v4109_v20  ;;  %2769 = vmatprep.subr.bf16.mxu1 %v4112_v21  ;;  %v4189_v19 = vld [vmem:[%s4510_s4 + $0x10] sm:$0xff]   ;;  %v4191_v21 = vld [vmem:[%s4510_s4 + $0x58] sm:$0xff]  }
 0x1e2   :  { %v4190_v20 = vld [vmem:[%s4510_s4 + $0x90] sm:$0xff]  }
 0x1e4   :  { %2684 = vmatpush1.bf16.msra.mxu0 %v4107_v22  ;;  %2770 = vmatpush1.bf16.msra.mxu1 %v4110_v23  ;;  %v4192_v22 = vld [vmem:[%s4510_s4 + $0xd8] sm:$0xff]  }
 0x1e5   :  { %2685 = vmatprep.subr.bf16.mxu0 %v4115_v24  ;;  %2771 = vmatprep.subr.bf16.mxu1 %v4118_v25  ;;  %v4193_v23 = vld [vmem:[%s4510_s4 + $0x18] sm:$0xff]   ;;  %v4195_v25 = vld [vmem:[%s4510_s4 + $0x60] sm:$0xff]  }
 0x1e6   :  { %v4194_v24 = vld [vmem:[%s4510_s4 + $0x98] sm:$0xff]  }
 0x1e8   :  { %2686 = vmatpush1.bf16.msra.mxu0 %v4113_v28  ;;  %2772 = vmatpush1.bf16.msra.mxu1 %v4116_v29  ;;  %v4196_v28 = vld [vmem:[%s4510_s4 + $0xe0] sm:$0xff]  }
 0x1e9   :  { %2687 = vmatprep.subr.bf16.mxu0 %v4121_v30  ;;  %2773 = vmatprep.subr.bf16.mxu1 %v4124_v31  ;;  %v4197_v29 = vld [vmem:[%s4510_s4 + $0x20] sm:$0xff]   ;;  %v4199_v31 = vld [vmem:[%s4510_s4 + $0x68] sm:$0xff]  }
 0x1ea   :  { %v4198_v30 = vld [vmem:[%s4510_s4 + $0xa0] sm:$0xff]  }
 0x1ec   :  { %2688 = vmatpush1.bf16.msra.mxu0 %v4119_v32  ;;  %2774 = vmatpush1.bf16.msra.mxu1 %v4122_v33  ;;  %v4200_v32 = vld [vmem:[%s4510_s4 + $0xe8] sm:$0xff]  }
 0x1ed   :  { %2689 = vmatprep.subr.bf16.mxu0 %v4127_v35  ;;  %2775 = vmatprep.subr.bf16.mxu1 %v4130_v38  ;;  %v4201_v33 = vld [vmem:[%s4510_s4 + $0x28] sm:$0xff]   ;;  %v4203_v38 = vld [vmem:[%s4510_s4 + $0x70] sm:$0xff]  }
 0x1ee   :  { %v4202_v35 = vld [vmem:[%s4510_s4 + $0xa8] sm:$0xff]  }
 0x1f0   :  { %2690 = vmatpush1.bf16.msra.mxu0 %v4125_v40  ;;  %2776 = vmatpush1.bf16.msra.mxu1 %v4128_v39  ;;  %v4204_v40 = vld [vmem:[%s4510_s4 + $0xf0] sm:$0xff]  }
 0x1f1   :  { %2691 = vmatprep.subr.bf16.mxu0 %v4133_v41  ;;  %2777 = vmatprep.subr.bf16.mxu1 %v4136_v42  ;;  %v4205_v39 = vld [vmem:[%s4510_s4 + $0x30] sm:$0xff]   ;;  %v4207_v42 = vld [vmem:[%s4510_s4 + $0x78] sm:$0xff]  }
 0x1f2   :  { %v4206_v41 = vld [vmem:[%s4510_s4 + $0xb0] sm:$0xff]  }
 0x1f4   :  { %2692 = vmatpush1.bf16.msra.mxu0 %v4131_v43  ;;  %2778 = vmatpush1.bf16.msra.mxu1 %v4134_v44  ;;  %v4208_v43 = vld [vmem:[%s4510_s4 + $0xf8] sm:$0xff]  }
 0x1f5   :  { %2693 = vmatprep.subr.bf16.mxu0 %v4139_v45  ;;  %2779 = vmatprep.subr.bf16.mxu1 %v4142_v46  ;;  %v4209_v44 = vld [vmem:[%s4510_s4 + $0x38] sm:$0xff]   ;;  %v1970_v46 = vld [vmem:[%s4509_s3] sm:$0xf] }
 0x1f6   :  { %v4210_v45 = vld [vmem:[%s4510_s4 + $0xb8] sm:$0xff]  }
 0x1f8   :  { %2694 = vmatpush1.bf16.msra.mxu0 %v4137_v47  ;;  %2780 = vmatpush1.bf16.msra.mxu1 %v4140_v48  ;;  %v1975_v47 = vrot.slane %v1970_v46, %v449_v26  ;;  %v1983_v48 = vrot.slane %v1970_v46, %v457_v27 }
 0x1f9   :  { %2695 = vmatprep.subr.bf16.mxu0 %v4145_v49  ;;  %2781 = vmatprep.subr.bf16.mxu1 %v4148_v50  ;;  %v1979_v49 = vrot.slane %v1970_v46, %v453_v36  ;;  %v1987_v50 = vrot.slane %v1970_v46, %v461_v37 }
 0x1fc   :  { %2696 = vmatpush1.bf16.msra.mxu0 %v4143_v51  ;;  %2782 = vmatpush1.bf16.msra.mxu1 %v4146_v52 }
 0x1fd   :  { %2697 = vmatprep.subr.bf16.mxu0 %v4151_v53  ;;  %2783 = vmatprep.subr.bf16.mxu1 %v4154_v54 }
 0x200   :  { %2698 = vmatpush1.bf16.msra.mxu0 %v4149_v55  ;;  %2784 = vmatpush1.bf16.msra.mxu1 %v4152_v56 }
 0x201   :  { %2699 = vmatprep.subr.bf16.mxu0 %v4157_v57  ;;  %2785 = vmatprep.subr.bf16.mxu1 %v4160_v58 }
 0x204   :  { %2700 = vmatpush1.bf16.msra.mxu0 %v4155_v59  ;;  %2786 = vmatpush1.bf16.msra.mxu1 %v4158_v60 }
 0x205   :  { %2701 = vmatprep.subr.bf16.mxu0 %v4163_v61  ;;  %2787 = vmatprep.subr.bf16.mxu1 %v4166_v62 }
 0x208   :  { %2702 = vmatpush1.bf16.msra.mxu0 %v4161_v63  ;;  %2788 = vmatpush1.bf16.msra.mxu1 %v4164_v0 }
 0x209   :  { %2703 = vmatprep.subr.bf16.mxu0 %v4169_v2  ;;  %2789 = vmatprep.subr.bf16.mxu1 %v4172_v3 }
 0x20c   :  { %2704 = vmatpush1.bf16.msra.mxu0 %v4167_v5  ;;  %2790 = vmatpush1.bf16.msra.mxu1 %v4170_v6 }
 0x20d   :  { %2705 = vmatprep.subr.bf16.mxu0 %v4175_v1  ;;  %2791 = vmatprep.subr.bf16.mxu1 %v4178_v7 }
 0x210   :  { %2706 = vmatpush1.bf16.msra.mxu0 %v4173_v8  ;;  %2792 = vmatpush1.bf16.msra.mxu1 %v4176_v9 }
 0x211   :  { %3590 = vmatprep.subr.bf16.mxu0 %v4179_v10  ;;  %3612 = vmatprep.subr.bf16.mxu1 %v4180_v11 }
 0x213   :  { %2708 = vmatmul.mubr.bf16.vlgmr.msra.gmra.mrb[4].mxu0 %v4389_v4  ;;  %2794 = vmatmul.mubr.bf16.vlgmr.msra.gmra.mrb[4].mxu1 %v4389_v4  ;;  %v4188_v4 = vld [vmem:[%s4510_s4 + $0xd0] sm:$0xff]  }
 0x214   :  { %3591 = vmatpush3.bf16.msra.mxu0 %v4181_v12  ;;  %3613 = vmatpush3.bf16.msra.mxu1 %v4182_v13  ;;  %v3516_v13 = vld [vmem:[%s4511_s5] ss:$0 sm:$0xff] }
 0x215   :  { %3592 = vmatprep.subr.bf16.mxu0 %v4183_v14  ;;  %3614 = vmatprep.subr.bf16.mxu1 %v4184_v15 }
 0x218   :  { %3593 = vmatpush3.bf16.msra.mxu0 %v4185_v16  ;;  %3615 = vmatpush3.bf16.msra.mxu1 %v4186_v17 }
 0x219   :  { %3594 = vmatprep.subr.bf16.mxu0 %v4187_v18  ;;  %3616 = vmatprep.subr.bf16.mxu1 %v4188_v4 }
 0x21c   :  { %3595 = vmatpush3.bf16.msra.mxu0 %v4189_v19  ;;  %3617 = vmatpush3.bf16.msra.mxu1 %v4190_v20 }
 0x21d   :  { %3596 = vmatprep.subr.bf16.mxu0 %v4191_v21  ;;  %3618 = vmatprep.subr.bf16.mxu1 %v4192_v22 }
 0x220   :  { %3597 = vmatpush3.bf16.msra.mxu0 %v4193_v23  ;;  %3619 = vmatpush3.bf16.msra.mxu1 %v4194_v24 }
 0x221   :  { %3598 = vmatprep.subr.bf16.mxu0 %v4195_v25  ;;  %3620 = vmatprep.subr.bf16.mxu1 %v4196_v28 }
 0x224   :  { %3599 = vmatpush3.bf16.msra.mxu0 %v4197_v29  ;;  %3621 = vmatpush3.bf16.msra.mxu1 %v4198_v30 }
 0x225   :  { %3600 = vmatprep.subr.bf16.mxu0 %v4199_v31  ;;  %3622 = vmatprep.subr.bf16.mxu1 %v4200_v32 }
 0x228   :  { %3601 = vmatpush3.bf16.msra.mxu0 %v4201_v33  ;;  %3623 = vmatpush3.bf16.msra.mxu1 %v4202_v35 }
 0x229   :  { %3602 = vmatprep.subr.bf16.mxu0 %v4203_v38  ;;  %3624 = vmatprep.subr.bf16.mxu1 %v4204_v40 }
 0x22c   :  { %3603 = vmatpush3.bf16.msra.mxu0 %v4205_v39  ;;  %3625 = vmatpush3.bf16.msra.mxu1 %v4206_v41 }
 0x22d   :  { %3604 = vmatprep.subr.bf16.mxu0 %v4207_v42  ;;  %3626 = vmatprep.subr.bf16.mxu1 %v4208_v43 }
 0x230   :  { %3605 = vmatpush3.bf16.msra.mxu0 %v4209_v44  ;;  %3627 = vmatpush3.bf16.msra.mxu1 %v4210_v45 }
 0x2e6   :  { %v2709_v51 = vpop.f32.mrb[4].mxu0  ;;  %v2795_v52 = vpop.f32.mrb[4].mxu1 }
 0x2e7   :  { %v3642_v53 = vadd.f32 %v2709_v51, %v1975_v47  ;;  %v3646_v54 = vadd.f32 %v2795_v52, %v1983_v48  ;;  %v2711_v55 = vpop.f32.mrb[5].mxu0  ;;  %v2797_v56 = vpop.f32.mrb[5].mxu1 }
 0x2e8   :  { %v3643_v57 = vadd.f32 %v2711_v55, %v1979_v49  ;;  %v3647_v58 = vadd.f32 %v2797_v56, %v1987_v50  ;;  %v2713_v59 = vpop.f32.mrb[6].mxu0  ;;  %v2799_v60 = vpop.f32.mrb[6].mxu1 }
 0x2e9   :  { %v3644_v26 = vadd.f32 %v2713_v59, %v1975_v47  ;;  %v3648_v61 = vadd.f32 %v2799_v60, %v1983_v48  ;;  %v2715_v62 = vpop.f32.mrb[7].mxu0  ;;  %v2801_v27 = vpop.f32.mrb[7].mxu1  ;;  %v2804_v36 = vmax.f32 %v3642_v53, 0.0  ;;  %v2806_v2 = vmax.f32 %v3646_v54, 0.0 }
 0x2ea   :  { %v3645_v63 = vadd.f32 %v2715_v62, %v1979_v49  ;;  %v3649_v0 = vadd.f32 %v2801_v27, %v1987_v50  ;;  %v2805_v3 = vmax.f32 %v3643_v57, 0.0  ;;  %v2807_v5 = vmax.f32 %v3647_v58, 0.0 }
 0x2eb   :  { %v2808_v34 = vmax.f32 %v3644_v26, 0.0  ;;  %v2810_v37 = vmax.f32 %v3648_v61, 0.0 }
 0x2ec   :  { %v2809_v6 = vmax.f32 %v3645_v63, 0.0  ;;  %v2811_v1 = vmax.f32 %v3649_v0, 0.0 }
 0x2ed   :  { %v2812_v7 = vpack.c.bf16 %v2808_v34, %v2804_v36  ;;  %v2814_v8 = vpack.c.bf16 %v2810_v37, %v2806_v2 }
 0x2ee   :  { %v2813_v9 = vpack.c.bf16 %v2809_v6, %v2805_v3  ;;  %v2815_v10 = vpack.c.bf16 %v2811_v1, %v2807_v5 }
 0x2f0   :  { %3111 = vmatprep.mubr.bf16.mxu0 %v2813_v9  ;;  %3152 = vmatprep.mubr.bf16.mxu1 %v2815_v10 }
 0x2f1   :  { %3112 = vmatmul.mubr.bf16.vlgmr.msra.gmra.mrb[8].mxu0 %v2812_v7  ;;  %3153 = vmatmul.mubr.bf16.vlgmr.msra.gmra.mrb[8].mxu1 %v2814_v8 }
 0x3c4   :  { %v3606_v11 = vpop.f32.mrb[8].mxu0  ;;  %v3628_v12 = vpop.f32.mrb[8].mxu1 }
 0x3c5   :  { %v3607_v14 = vpop.f32.mrb[9].mxu0  ;;  %v3629_v15 = vpop.f32.mrb[9].mxu1 }
 0x3c6   :  { %v3608_v16 = vadd.f32 %v3607_v14, %v3606_v11  ;;  %v3630_v17 = vadd.f32 %v3629_v15, %v3628_v12  ;;  %v3609_v18 = vpop.f32.mrb[10].mxu0  ;;  %v3631_v4 = vpop.f32.mrb[10].mxu1 }
 0x3c7   :  { %v3610_v19 = vpop.f32.mrb[11].mxu0  ;;  %v3632_v20 = vpop.f32.mrb[11].mxu1 }
 0x3c8   :  { %v3114_v21 = vadd.f32 %v3608_v16, %v3516_v13  ;;  %v3611_v22 = vadd.f32 %v3610_v19, %v3609_v18  ;;  %v3633_v23 = vadd.f32 %v3632_v20, %v3631_v4 }
 0x3ca   :  { %v3155_v24 = vadd.f32 %v3630_v17, %v3114_v21  ;;  %v3117_v25 = vadd.f32 %v3611_v22, %v3516_v13 }
 0x3cc   :  { %v3158_v28 = vadd.f32 %v3633_v23, %v3117_v25 }
 0x3ce   :  { %v3586_v29 = vpack.c.bf16 %v3158_v28, %v3155_v24 }
 0x3d0   :  { %3587 = vst [vmem:[%s4514_s8] sm:$0xff] %v3586_v29  }
 0x3d1   :  { %3175 = vsyncpa [#allocation8], 1 }
 0x3d2   :  { %3176 = vsyncpa [#allocation10], 1 }

</bundles_post_ra>
